<compile_context>
chip_gen: v5e
topology: v5e:2x2
jax: 0.10.0
libtpu: 0.0.40
codegen_flags: <defaults>
</compile_context>

<pallas_src>
import functools

import jax
import jax.numpy as jnp
from jax.experimental import pallas as pl
from jax.experimental.pallas import tpu as pltpu

EXPANSION = 1
_VMEM_LIMIT_BYTES = 48 * 1024 * 1024   # <= v7x physical VMEM per TensorCore


# ------------------------------ Pallas kernel ------------------------------

def _basic_block_kernel(*refs, s, ho, wo, cout, has_proj):
    """Fused BasicBlock forward for one sample.

    Activations are laid out as flattened (Ho+2)*(Wo+2) "padded pixel grids"
    with channels on lanes; conv taps become constant row offsets of the flat
    grid, so every MXU operand is a static contiguous row-slice.
    """
    if has_proj:
        (ph_ref, mask_ref, w1_ref, b1_ref, w2_ref, b2_ref,
         ws_ref, bs_ref, o_ref, ybuf) = refs
    else:
        (ph_ref, mask_ref, w1_ref, b1_ref, w2_ref, b2_ref,
         o_ref, ybuf) = refs
        ws_ref = bs_ref = None

    gr, gc = ho + 2, wo + 2
    g = gr * gc
    pad2 = gc + 1                                 # conv2 halo, in flat rows

    # ---- conv1 (3x3, stride s) + BN1: 9 shifted matmuls, f32 accumulation ----
    acc = None
    for kh in range(3):
        for kw in range(3):
            pidx = (kh % s) * s + (kw % s)        # space-to-depth phase
            off = (kh // s) * gc + (kw // s)      # flat-row shift
            lhs = ph_ref[0, pidx, off:off + g, :]            # (g, cin) bf16
            part = jnp.dot(lhs, w1_ref[kh * 3 + kw],
                           preferred_element_type=jnp.float32)
            acc = part if acc is None else acc + part

    # ---- shortcut: centre tap of the same flat layout ----
    c_pidx = (1 % s) * s + (1 % s)
    c_off = (1 // s) * gc + (1 // s)
    sc_lhs = ph_ref[0, c_pidx, c_off:c_off + g, :]           # (g, cin) bf16
    if has_proj:
        sc = jnp.dot(sc_lhs, ws_ref[...],
                     preferred_element_type=jnp.float32) + bs_ref[...]
    else:
        sc = sc_lhs.astype(jnp.float32)           # identity (cin == cout)

    # ---- bias + ReLU, zero the padded border, stash y in VMEM (never to HBM) ----
    y = jnp.maximum(acc + b1_ref[...], 0.0) * mask_ref[...]
    ybuf[0:pad2, :] = jnp.zeros((pad2, cout), ybuf.dtype)
    ybuf[pad2 + g:, :] = jnp.zeros((pad2, cout), ybuf.dtype)
    ybuf[pad2:pad2 + g, :] = y.astype(ybuf.dtype)

    # ---- conv2 (3x3, stride 1) + BN2 on the in-VMEM y ----
    acc2 = None
    for kh in range(3):
        for kw in range(3):
            start = pad2 + (kh - 1) * gc + (kw - 1)
            lhs = ybuf[start:start + g, :]                   # (g, cout) bf16
            part = jnp.dot(lhs, w2_ref[kh * 3 + kw],
                           preferred_element_type=jnp.float32)
            acc2 = part if acc2 is None else acc2 + part

    # ---- residual add + ReLU ----
    o_ref[0] = jnp.maximum(acc2 + b2_ref[...] + sc, 0.0).astype(o_ref.dtype)


# ------------------------------ glue helpers ------------------------------

def fold_bn(gamma, beta, mean, var, eps=1e-5):
    # TODO(synk): PyTorch training-mode BN uses batch statistics; BN here is
    # folded in inference mode (running stats -> scale/bias).
    scale = gamma / jnp.sqrt(var + eps)
    bias = beta - mean * scale
    return scale, bias


def _fold_conv_bn(w_hwio, bn):
    """Fold BN scale into conv weights -> ((K*K, Cin, Cout) bf16, (1,Cout) f32)."""
    scale, bias = fold_bn(*bn)
    kh, kw, cin, cout = w_hwio.shape
    wf = w_hwio.astype(jnp.float32) * scale[None, None, None, :]
    wf = wf.reshape(kh * kw, cin, cout).astype(jnp.bfloat16)
    return wf, bias.reshape(1, cout).astype(jnp.float32)


def _space_to_depth_phases(x_nhwc, s, ho, wo, pad_tail):
    """Phase decomposition of the zero-padded input on the flat output grid.

    phases[n, di*s+dj, a*gc+b, :] == x_pad[n, s*(a-1)+di, s*(b-1)+dj, :]
    (zero where out of range), flattened and tail-padded so every conv tap is
    a static, in-bounds row slice inside the kernel.  ~1x the input volume.
    """
    n, h, w, c = x_nhwc.shape
    gr, gc = ho + 2, wo + 2
    xp = jnp.pad(x_nhwc, ((0, 0), (1, 1), (1, 1), (0, 0)))
    phases = []
    for di in range(s):
        for dj in range(s):
            core = xp[:, di::s, dj::s, :][:, :gr - 1, :gc - 1, :]
            ph = jnp.pad(core, ((0, 0),
                                (1, gr - 1 - core.shape[1]),
                                (1, gc - 1 - core.shape[2]),
                                (0, 0)))
            phases.append(ph.reshape(n, gr * gc, c))
    phases = jnp.stack(phases, axis=1)                        # (n, s*s, g, c)
    phases = jnp.pad(phases, ((0, 0), (0, 0), (0, pad_tail), (0, 0)))
    return phases.astype(jnp.bfloat16)


# ------------------------- BasicBlock forward pass -------------------------

def basic_block_forward(x_nchw, params, in_planes, res_planes, p_stride):
    # NCHW -> NHWC at the block boundary (channels-last inside).
    # TODO(synk): in a full ResNet keep activations NHWC end-to-end and drop
    # these two boundary transposes.
    x = jnp.transpose(x_nchw, (0, 2, 3, 1)).astype(jnp.float32)
    n, h, w, cin = x.shape
    cout = res_planes
    s = p_stride
    ho = (h + 2 - 3) // s + 1
    wo = (w + 2 - 3) // s + 1
    gr, gc = ho + 2, wo + 2
    g = gr * gc
    qmax = 2 // s
    pad_tail = qmax * gc + qmax
    gp = g + pad_tail

    has_proj = (p_stride != 1) or (in_planes != EXPANSION * res_planes)

    phases = _space_to_depth_phases(x, s, ho, wo, pad_tail)   # (n, s*s, gp, cin)

    # Interior mask of the flat (Ho+2)x(Wo+2) grid (zeroes conv1's padded border).
    rows = jnp.arange(g) // gc
    cols = jnp.arange(g) % gc
    mask = (((rows >= 1) & (rows <= ho) & (cols >= 1) & (cols <= wo))
            .astype(jnp.float32).reshape(g, 1))

    w1, b1 = _fold_conv_bn(params["w1"], params["bn1"])       # (9,cin,cout)
    w2, b2 = _fold_conv_bn(params["w2"], params["bn2"])       # (9,cout,cout)

    args = [phases, mask, w1, b1, w2, b2]
    in_specs = [
        pl.BlockSpec((1, s * s, gp, cin), lambda b: (b, 0, 0, 0)),
        pl.BlockSpec((g, 1), lambda b: (0, 0)),
        pl.BlockSpec((9, cin, cout), lambda b: (0, 0, 0)),
        pl.BlockSpec((1, cout), lambda b: (0, 0)),
        pl.BlockSpec((9, cout, cout), lambda b: (0, 0, 0)),
        pl.BlockSpec((1, cout), lambda b: (0, 0)),
    ]
    if has_proj:
        wsf, bs = _fold_conv_bn(params["ws"], params["bns"])  # (1,cin,cout)
        args += [wsf[0], bs]
        in_specs += [pl.BlockSpec((cin, cout), lambda b: (0, 0)),
                     pl.BlockSpec((1, cout), lambda b: (0, 0))]

    kernel = functools.partial(_basic_block_kernel, s=s, ho=ho, wo=wo,
                               cout=cout, has_proj=has_proj)

    flops = 2 * n * g * cout * (9 * cin + 9 * cout + (cin if has_proj else 0))
    bytes_accessed = (phases.size * 2 + mask.size * 4 + w1.size * 2
                      + w2.size * 2 + 2 * cout * 4 + n * g * cout * 4)

    out_flat = pl.pallas_call(
        kernel,
        out_shape=jax.ShapeDtypeStruct((n, g, cout), jnp.float32),
        grid=(n,),
        in_specs=in_specs,
        out_specs=pl.BlockSpec((1, g, cout), lambda b: (b, 0, 0)),
        scratch_shapes=[pltpu.VMEM((g + 2 * (gc + 1), cout), jnp.bfloat16)],
        compiler_params=pltpu.CompilerParams(
            dimension_semantics=("parallel",),
            vmem_limit_bytes=_VMEM_LIMIT_BYTES),
        cost_estimate=pl.CostEstimate(flops=int(flops), transcendentals=0,
                                      bytes_accessed=int(bytes_accessed)),
    )(*args)

    out = out_flat.reshape(n, gr, gc, cout)[:, 1:ho + 1, 1:wo + 1, :]
    return jnp.transpose(out, (0, 3, 1, 2))                   # NHWC -> NCHW


# ------------------------- deterministic parameters -------------------------

def init_basic_block_params(key, in_planes, res_planes):
    keys = jax.random.split(key, 6)

    def conv_w(k, kh, kw, cin, cout):
        fan_in = kh * kw * cin
        return (jax.random.normal(k, (kh, kw, cin, cout), jnp.float32)
                / jnp.sqrt(float(fan_in)))

    def bn_params(k, c):
        k1, k2, k3, k4 = jax.random.split(k, 4)
        gamma = 1.0 + 0.1 * jax.random.normal(k1, (c,), jnp.float32)
        beta = 0.1 * jax.random.normal(k2, (c,), jnp.float32)
        mean = 0.1 * jax.random.normal(k3, (c,), jnp.float32)
        var = jnp.abs(jax.random.normal(k4, (c,), jnp.float32)) + 0.5
        return gamma, beta, mean, var

    return {
        "w1": conv_w(keys[0], 3, 3, in_planes, res_planes),
        "bn1": bn_params(keys[1], res_planes),
        "w2": conv_w(keys[2], 3, 3, res_planes, res_planes),
        "bn2": bn_params(keys[3], res_planes),
        "ws": conv_w(keys[4], 1, 1, in_planes, res_planes),
        "bns": bn_params(keys[5], res_planes),
    }


# ---------------------------- pure-JAX reference ----------------------------

def ref_forward(x_nchw, params, in_planes, res_planes, p_stride):
    def conv(x, w_hwio, stride, pad):
        return jax.lax.conv_general_dilated(
            x, w_hwio, window_strides=(stride, stride),
            padding=((pad, pad), (pad, pad)),
            dimension_numbers=("NCHW", "HWIO", "NCHW"),
            precision=jax.lax.Precision.HIGHEST)

    def bn(x, p):
        s, b = fold_bn(*p)
        return x * s[None, :, None, None] + b[None, :, None, None]

    y = jax.nn.relu(bn(conv(x_nchw, params["w1"], p_stride, 1), params["bn1"]))
    y = bn(conv(y, params["w2"], 1, 1), params["bn2"])
    if p_stride != 1 or in_planes != EXPANSION * res_planes:
        sc = bn(conv(x_nchw, params["ws"], p_stride, 0), params["bns"])
    else:
        sc = x_nchw
    return jax.nn.relu(y + sc)


# ----------------------------------- main -----------------------------------

if __name__ == "__main__":
    key = jax.random.PRNGKey(0)
    kx, kp, kx2, kp2 = jax.random.split(key, 4)

    # Case 1: projection shortcut (stride 2, channel change) — main spec case.
    in_planes, res_planes, p_stride = 4, 8, 2
    x = jax.random.normal(kx, (2, in_planes, 16, 16), jnp.float32)     # NCHW
    params = init_basic_block_params(kp, in_planes, res_planes)
    fwd = jax.jit(functools.partial(
        basic_block_forward, in_planes=in_planes, res_planes=res_planes,
        p_stride=p_stride))
    out = jax.block_until_ready(fwd(x, params))
    ref = ref_forward(x, params, in_planes, res_planes, p_stride)
    assert out.shape == ref.shape == (2, res_planes, 8, 8), out.shape
    rel = float(jnp.max(jnp.abs(out - ref) / (1.0 + jnp.abs(ref))))
    assert rel < 5e-2, f"projection-path mismatch: rel_err={rel}"

    # Case 2: identity shortcut (stride 1, same channels).
    in2, res2, st2 = 8, 8, 1
    x2 = jax.random.normal(kx2, (2, in2, 16, 16), jnp.float32)
    params2 = init_basic_block_params(kp2, in2, res2)
    fwd2 = jax.jit(functools.partial(
        basic_block_forward, in_planes=in2, res_planes=res2, p_stride=st2))
    out2 = jax.block_until_ready(fwd2(x2, params2))
    ref2 = ref_forward(x2, params2, in2, res2, st2)
    assert out2.shape == ref2.shape == (2, res2, 16, 16), out2.shape
    rel2 = float(jnp.max(jnp.abs(out2 - ref2) / (1.0 + jnp.abs(ref2))))
    assert rel2 < 5e-2, f"identity-path mismatch: rel_err={rel2}"

    print("KERNEL_OK")
</pallas_src>

<mosaic_0001>
module attributes {stable_mosaic.version = 11 : i64} {
  func.func @_basic_block_kernel(%arg0: i32, %arg1: memref<1x4x111x4xbf16, #tpu.memory_space<vmem>>, %arg2: memref<100x1xf32, #tpu.memory_space<vmem>>, %arg3: memref<9x4x8xbf16, #tpu.memory_space<vmem>>, %arg4: memref<1x8xf32, #tpu.memory_space<vmem>>, %arg5: memref<9x8x8xbf16, #tpu.memory_space<vmem>>, %arg6: memref<1x8xf32, #tpu.memory_space<vmem>>, %arg7: memref<4x8xbf16, #tpu.memory_space<vmem>>, %arg8: memref<1x8xf32, #tpu.memory_space<vmem>>, %arg9: memref<1x100x8xf32, #tpu.memory_space<vmem>>, %arg10: memref<122x8xbf16, #tpu.memory_space<vmem>>) attributes {dimension_semantics = [#tpu.dimension_semantics<parallel>], iteration_bounds = array<i64: 2>, scalar_prefetch = 0 : i64, scratch_operands = 1 : i64, tpu.core_type = #tpu.core_type<tc>, window_params = [{transform_indices = @transform_0, window_bounds = array<i64: 1, 4, 111, 4>}, {pipeline_mode = #tpu.pipeline_mode<synchronous>, transform_indices = @transform_1, window_bounds = array<i64: 100, 1>}, {pipeline_mode = #tpu.pipeline_mode<synchronous>, transform_indices = @transform_2, window_bounds = array<i64: 9, 4, 8>}, {pipeline_mode = #tpu.pipeline_mode<synchronous>, transform_indices = @transform_3, window_bounds = array<i64: 1, 8>}, {pipeline_mode = #tpu.pipeline_mode<synchronous>, transform_indices = @transform_4, window_bounds = array<i64: 9, 8, 8>}, {pipeline_mode = #tpu.pipeline_mode<synchronous>, transform_indices = @transform_5, window_bounds = array<i64: 1, 8>}, {pipeline_mode = #tpu.pipeline_mode<synchronous>, transform_indices = @transform_6, window_bounds = array<i64: 4, 8>}, {pipeline_mode = #tpu.pipeline_mode<synchronous>, transform_indices = @transform_7, window_bounds = array<i64: 1, 8>}, {transform_indices = @transform_8, window_bounds = array<i64: 1, 100, 8>}]} {
    %c0 = arith.constant 0 : index
    %c0_0 = arith.constant 0 : index
    %c0_1 = arith.constant 0 : index
    %c0_2 = arith.constant 0 : index
    %0 = vector.load %arg1[%c0, %c0_0, %c0_1, %c0_2] : memref<1x4x111x4xbf16, #tpu.memory_space<vmem>>, vector<1x1x100x4xbf16>
    %1 = vector.shape_cast %0 : vector<1x1x100x4xbf16> to vector<100x4xbf16>
    %c0_3 = arith.constant 0 : index
    %c0_4 = arith.constant 0 : index
    %c0_5 = arith.constant 0 : index
    %2 = vector.load %arg3[%c0_3, %c0_4, %c0_5] : memref<9x4x8xbf16, #tpu.memory_space<vmem>>, vector<1x4x8xbf16>
    %3 = vector.shape_cast %2 : vector<1x4x8xbf16> to vector<4x8xbf16>
    %cst = arith.constant dense<0.000000e+00> : vector<100x8xf32>
    %4 = tpu.matmul %1, %3, %cst {dimension_numbers = #tpu.dot_dimension_numbers<[1], [0], [0], [1], [0, 0, 1, 1], [], []>} : vector<100x4xbf16>, vector<4x8xbf16>, vector<100x8xf32> -> vector<100x8xf32>
    %c0_6 = arith.constant 0 : index
    %c1 = arith.constant 1 : index
    %c0_7 = arith.constant 0 : index
    %c0_8 = arith.constant 0 : index
    %5 = vector.load %arg1[%c0_6, %c1, %c0_7, %c0_8] : memref<1x4x111x4xbf16, #tpu.memory_space<vmem>>, vector<1x1x100x4xbf16>
    %6 = vector.shape_cast %5 : vector<1x1x100x4xbf16> to vector<100x4xbf16>
    %c1_9 = arith.constant 1 : index
    %c0_10 = arith.constant 0 : index
    %c0_11 = arith.constant 0 : index
    %7 = vector.load %arg3[%c1_9, %c0_10, %c0_11] : memref<9x4x8xbf16, #tpu.memory_space<vmem>>, vector<1x4x8xbf16>
    %8 = vector.shape_cast %7 : vector<1x4x8xbf16> to vector<4x8xbf16>
    %cst_12 = arith.constant dense<0.000000e+00> : vector<100x8xf32>
    %9 = tpu.matmul %6, %8, %cst_12 {dimension_numbers = #tpu.dot_dimension_numbers<[1], [0], [0], [1], [0, 0, 1, 1], [], []>} : vector<100x4xbf16>, vector<4x8xbf16>, vector<100x8xf32> -> vector<100x8xf32>
    %10 = arith.addf %4, %9 : vector<100x8xf32>
    %c0_13 = arith.constant 0 : index
    %c0_14 = arith.constant 0 : index
    %c1_15 = arith.constant 1 : index
    %c0_16 = arith.constant 0 : index
    %11 = vector.load %arg1[%c0_13, %c0_14, %c1_15, %c0_16] : memref<1x4x111x4xbf16, #tpu.memory_space<vmem>>, vector<1x1x100x4xbf16>
    %12 = vector.shape_cast %11 : vector<1x1x100x4xbf16> to vector<100x4xbf16>
    %c2 = arith.constant 2 : index
    %c0_17 = arith.constant 0 : index
    %c0_18 = arith.constant 0 : index
    %13 = vector.load %arg3[%c2, %c0_17, %c0_18] : memref<9x4x8xbf16, #tpu.memory_space<vmem>>, vector<1x4x8xbf16>
    %14 = vector.shape_cast %13 : vector<1x4x8xbf16> to vector<4x8xbf16>
    %cst_19 = arith.constant dense<0.000000e+00> : vector<100x8xf32>
    %15 = tpu.matmul %12, %14, %cst_19 {dimension_numbers = #tpu.dot_dimension_numbers<[1], [0], [0], [1], [0, 0, 1, 1], [], []>} : vector<100x4xbf16>, vector<4x8xbf16>, vector<100x8xf32> -> vector<100x8xf32>
    %16 = arith.addf %10, %15 : vector<100x8xf32>
    %c0_20 = arith.constant 0 : index
    %c2_21 = arith.constant 2 : index
    %c0_22 = arith.constant 0 : index
    %c0_23 = arith.constant 0 : index
    %17 = vector.load %arg1[%c0_20, %c2_21, %c0_22, %c0_23] : memref<1x4x111x4xbf16, #tpu.memory_space<vmem>>, vector<1x1x100x4xbf16>
    %18 = vector.shape_cast %17 : vector<1x1x100x4xbf16> to vector<100x4xbf16>
    %c3 = arith.constant 3 : index
    %c0_24 = arith.constant 0 : index
    %c0_25 = arith.constant 0 : index
    %19 = vector.load %arg3[%c3, %c0_24, %c0_25] : memref<9x4x8xbf16, #tpu.memory_space<vmem>>, vector<1x4x8xbf16>
    %20 = vector.shape_cast %19 : vector<1x4x8xbf16> to vector<4x8xbf16>
    %cst_26 = arith.constant dense<0.000000e+00> : vector<100x8xf32>
    %21 = tpu.matmul %18, %20, %cst_26 {dimension_numbers = #tpu.dot_dimension_numbers<[1], [0], [0], [1], [0, 0, 1, 1], [], []>} : vector<100x4xbf16>, vector<4x8xbf16>, vector<100x8xf32> -> vector<100x8xf32>
    %22 = arith.addf %16, %21 : vector<100x8xf32>
    %c0_27 = arith.constant 0 : index
    %c3_28 = arith.constant 3 : index
    %c0_29 = arith.constant 0 : index
    %c0_30 = arith.constant 0 : index
    %23 = vector.load %arg1[%c0_27, %c3_28, %c0_29, %c0_30] : memref<1x4x111x4xbf16, #tpu.memory_space<vmem>>, vector<1x1x100x4xbf16>
    %24 = vector.shape_cast %23 : vector<1x1x100x4xbf16> to vector<100x4xbf16>
    %c4 = arith.constant 4 : index
    %c0_31 = arith.constant 0 : index
    %c0_32 = arith.constant 0 : index
    %25 = vector.load %arg3[%c4, %c0_31, %c0_32] : memref<9x4x8xbf16, #tpu.memory_space<vmem>>, vector<1x4x8xbf16>
    %26 = vector.shape_cast %25 : vector<1x4x8xbf16> to vector<4x8xbf16>
    %cst_33 = arith.constant dense<0.000000e+00> : vector<100x8xf32>
    %27 = tpu.matmul %24, %26, %cst_33 {dimension_numbers = #tpu.dot_dimension_numbers<[1], [0], [0], [1], [0, 0, 1, 1], [], []>} : vector<100x4xbf16>, vector<4x8xbf16>, vector<100x8xf32> -> vector<100x8xf32>
    %28 = arith.addf %22, %27 : vector<100x8xf32>
    %c0_34 = arith.constant 0 : index
    %c2_35 = arith.constant 2 : index
    %c1_36 = arith.constant 1 : index
    %c0_37 = arith.constant 0 : index
    %29 = vector.load %arg1[%c0_34, %c2_35, %c1_36, %c0_37] : memref<1x4x111x4xbf16, #tpu.memory_space<vmem>>, vector<1x1x100x4xbf16>
    %30 = vector.shape_cast %29 : vector<1x1x100x4xbf16> to vector<100x4xbf16>
    %c5 = arith.constant 5 : index
    %c0_38 = arith.constant 0 : index
    %c0_39 = arith.constant 0 : index
    %31 = vector.load %arg3[%c5, %c0_38, %c0_39] : memref<9x4x8xbf16, #tpu.memory_space<vmem>>, vector<1x4x8xbf16>
    %32 = vector.shape_cast %31 : vector<1x4x8xbf16> to vector<4x8xbf16>
    %cst_40 = arith.constant dense<0.000000e+00> : vector<100x8xf32>
    %33 = tpu.matmul %30, %32, %cst_40 {dimension_numbers = #tpu.dot_dimension_numbers<[1], [0], [0], [1], [0, 0, 1, 1], [], []>} : vector<100x4xbf16>, vector<4x8xbf16>, vector<100x8xf32> -> vector<100x8xf32>
    %34 = arith.addf %28, %33 : vector<100x8xf32>
    %c0_41 = arith.constant 0 : index
    %c0_42 = arith.constant 0 : index
    %c10 = arith.constant 10 : index
    %c0_43 = arith.constant 0 : index
    %35 = vector.load %arg1[%c0_41, %c0_42, %c10, %c0_43] : memref<1x4x111x4xbf16, #tpu.memory_space<vmem>>, vector<1x1x100x4xbf16>
    %36 = vector.shape_cast %35 : vector<1x1x100x4xbf16> to vector<100x4xbf16>
    %c6 = arith.constant 6 : index
    %c0_44 = arith.constant 0 : index
    %c0_45 = arith.constant 0 : index
    %37 = vector.load %arg3[%c6, %c0_44, %c0_45] : memref<9x4x8xbf16, #tpu.memory_space<vmem>>, vector<1x4x8xbf16>
    %38 = vector.shape_cast %37 : vector<1x4x8xbf16> to vector<4x8xbf16>
    %cst_46 = arith.constant dense<0.000000e+00> : vector<100x8xf32>
    %39 = tpu.matmul %36, %38, %cst_46 {dimension_numbers = #tpu.dot_dimension_numbers<[1], [0], [0], [1], [0, 0, 1, 1], [], []>} : vector<100x4xbf16>, vector<4x8xbf16>, vector<100x8xf32> -> vector<100x8xf32>
    %40 = arith.addf %34, %39 : vector<100x8xf32>
    %c0_47 = arith.constant 0 : index
    %c1_48 = arith.constant 1 : index
    %c10_49 = arith.constant 10 : index
    %c0_50 = arith.constant 0 : index
    %41 = vector.load %arg1[%c0_47, %c1_48, %c10_49, %c0_50] : memref<1x4x111x4xbf16, #tpu.memory_space<vmem>>, vector<1x1x100x4xbf16>
    %42 = vector.shape_cast %41 : vector<1x1x100x4xbf16> to vector<100x4xbf16>
    %c7 = arith.constant 7 : index
    %c0_51 = arith.constant 0 : index
    %c0_52 = arith.constant 0 : index
    %43 = vector.load %arg3[%c7, %c0_51, %c0_52] : memref<9x4x8xbf16, #tpu.memory_space<vmem>>, vector<1x4x8xbf16>
    %44 = vector.shape_cast %43 : vector<1x4x8xbf16> to vector<4x8xbf16>
    %cst_53 = arith.constant dense<0.000000e+00> : vector<100x8xf32>
    %45 = tpu.matmul %42, %44, %cst_53 {dimension_numbers = #tpu.dot_dimension_numbers<[1], [0], [0], [1], [0, 0, 1, 1], [], []>} : vector<100x4xbf16>, vector<4x8xbf16>, vector<100x8xf32> -> vector<100x8xf32>
    %46 = arith.addf %40, %45 : vector<100x8xf32>
    %c0_54 = arith.constant 0 : index
    %c0_55 = arith.constant 0 : index
    %c11 = arith.constant 11 : index
    %c0_56 = arith.constant 0 : index
    %47 = vector.load %arg1[%c0_54, %c0_55, %c11, %c0_56] : memref<1x4x111x4xbf16, #tpu.memory_space<vmem>>, vector<1x1x100x4xbf16>
    %48 = vector.shape_cast %47 : vector<1x1x100x4xbf16> to vector<100x4xbf16>
    %c8 = arith.constant 8 : index
    %c0_57 = arith.constant 0 : index
    %c0_58 = arith.constant 0 : index
    %49 = vector.load %arg3[%c8, %c0_57, %c0_58] : memref<9x4x8xbf16, #tpu.memory_space<vmem>>, vector<1x4x8xbf16>
    %50 = vector.shape_cast %49 : vector<1x4x8xbf16> to vector<4x8xbf16>
    %cst_59 = arith.constant dense<0.000000e+00> : vector<100x8xf32>
    %51 = tpu.matmul %48, %50, %cst_59 {dimension_numbers = #tpu.dot_dimension_numbers<[1], [0], [0], [1], [0, 0, 1, 1], [], []>} : vector<100x4xbf16>, vector<4x8xbf16>, vector<100x8xf32> -> vector<100x8xf32>
    %52 = arith.addf %46, %51 : vector<100x8xf32>
    %c0_60 = arith.constant 0 : index
    %c3_61 = arith.constant 3 : index
    %c0_62 = arith.constant 0 : index
    %c0_63 = arith.constant 0 : index
    %53 = vector.load %arg1[%c0_60, %c3_61, %c0_62, %c0_63] : memref<1x4x111x4xbf16, #tpu.memory_space<vmem>>, vector<1x1x100x4xbf16>
    %54 = vector.shape_cast %53 : vector<1x1x100x4xbf16> to vector<100x4xbf16>
    %c0_64 = arith.constant 0 : index
    %c0_65 = arith.constant 0 : index
    %55 = vector.load %arg7[%c0_64, %c0_65] : memref<4x8xbf16, #tpu.memory_space<vmem>>, vector<4x8xbf16>
    %cst_66 = arith.constant dense<0.000000e+00> : vector<100x8xf32>
    %56 = tpu.matmul %54, %55, %cst_66 {dimension_numbers = #tpu.dot_dimension_numbers<[1], [0], [0], [1], [0, 0, 1, 1], [], []>} : vector<100x4xbf16>, vector<4x8xbf16>, vector<100x8xf32> -> vector<100x8xf32>
    %c0_67 = arith.constant 0 : index
    %c0_68 = arith.constant 0 : index
    %57 = vector.load %arg8[%c0_67, %c0_68] : memref<1x8xf32, #tpu.memory_space<vmem>>, vector<1x8xf32>
    %58 = vector.broadcast %57 : vector<1x8xf32> to vector<100x8xf32>
    %59 = arith.addf %56, %58 : vector<100x8xf32>
    %c0_69 = arith.constant 0 : index
    %c0_70 = arith.constant 0 : index
    %60 = vector.load %arg4[%c0_69, %c0_70] : memref<1x8xf32, #tpu.memory_space<vmem>>, vector<1x8xf32>
    %61 = vector.broadcast %60 : vector<1x8xf32> to vector<100x8xf32>
    %62 = arith.addf %52, %61 : vector<100x8xf32>
    %cst_71 = arith.constant 0.000000e+00 : f32
    %63 = vector.broadcast %cst_71 : f32 to vector<100x8xf32>
    %64 = arith.maximumf %62, %63 : vector<100x8xf32>
    %c0_72 = arith.constant 0 : index
    %c0_73 = arith.constant 0 : index
    %65 = vector.load %arg2[%c0_72, %c0_73] : memref<100x1xf32, #tpu.memory_space<vmem>>, vector<100x1xf32>
    %66 = vector.broadcast %65 : vector<100x1xf32> to vector<100x8xf32>
    %67 = arith.mulf %64, %66 : vector<100x8xf32>
    %cst_74 = arith.constant 0.000000e+00 : bf16
    %68 = vector.broadcast %cst_74 : bf16 to vector<11x8xbf16>
    %c0_75 = arith.constant 0 : index
    %c0_76 = arith.constant 0 : index
    %69 = vector.load %arg10[%c0_75, %c0_76] : memref<122x8xbf16, #tpu.memory_space<vmem>>, vector<11x8xbf16>
    tpu.vector_store %arg10[%c0_75, %c0_76], %68 {strides = array<i32>} : memref<122x8xbf16, #tpu.memory_space<vmem>>, vector<11x8xbf16>,
    %cst_77 = arith.constant 0.000000e+00 : bf16
    %70 = vector.broadcast %cst_77 : bf16 to vector<11x8xbf16>
    %c111 = arith.constant 111 : index
    %c0_78 = arith.constant 0 : index
    %71 = vector.load %arg10[%c111, %c0_78] : memref<122x8xbf16, #tpu.memory_space<vmem>>, vector<11x8xbf16>
    tpu.vector_store %arg10[%c111, %c0_78], %70 {strides = array<i32>} : memref<122x8xbf16, #tpu.memory_space<vmem>>, vector<11x8xbf16>,
    %72 = arith.truncf %67 : vector<100x8xf32> to vector<100x8xbf16>
    %c11_79 = arith.constant 11 : index
    %c0_80 = arith.constant 0 : index
    %73 = vector.load %arg10[%c11_79, %c0_80] : memref<122x8xbf16, #tpu.memory_space<vmem>>, vector<100x8xbf16>
    tpu.vector_store %arg10[%c11_79, %c0_80], %72 {strides = array<i32>} : memref<122x8xbf16, #tpu.memory_space<vmem>>, vector<100x8xbf16>,
    %c0_81 = arith.constant 0 : index
    %c0_82 = arith.constant 0 : index
    %74 = vector.load %arg10[%c0_81, %c0_82] : memref<122x8xbf16, #tpu.memory_space<vmem>>, vector<100x8xbf16>
    %c0_83 = arith.constant 0 : index
    %c0_84 = arith.constant 0 : index
    %c0_85 = arith.constant 0 : index
    %75 = vector.load %arg5[%c0_83, %c0_84, %c0_85] : memref<9x8x8xbf16, #tpu.memory_space<vmem>>, vector<1x8x8xbf16>
    %76 = vector.shape_cast %75 : vector<1x8x8xbf16> to vector<8x8xbf16>
    %cst_86 = arith.constant dense<0.000000e+00> : vector<100x8xf32>
    %77 = tpu.matmul %74, %76, %cst_86 {dimension_numbers = #tpu.dot_dimension_numbers<[1], [0], [0], [1], [0, 0, 1, 1], [], []>} : vector<100x8xbf16>, vector<8x8xbf16>, vector<100x8xf32> -> vector<100x8xf32>
    %c1_87 = arith.constant 1 : index
    %c0_88 = arith.constant 0 : index
    %78 = vector.load %arg10[%c1_87, %c0_88] : memref<122x8xbf16, #tpu.memory_space<vmem>>, vector<100x8xbf16>
    %c1_89 = arith.constant 1 : index
    %c0_90 = arith.constant 0 : index
    %c0_91 = arith.constant 0 : index
    %79 = vector.load %arg5[%c1_89, %c0_90, %c0_91] : memref<9x8x8xbf16, #tpu.memory_space<vmem>>, vector<1x8x8xbf16>
    %80 = vector.shape_cast %79 : vector<1x8x8xbf16> to vector<8x8xbf16>
    %cst_92 = arith.constant dense<0.000000e+00> : vector<100x8xf32>
    %81 = tpu.matmul %78, %80, %cst_92 {dimension_numbers = #tpu.dot_dimension_numbers<[1], [0], [0], [1], [0, 0, 1, 1], [], []>} : vector<100x8xbf16>, vector<8x8xbf16>, vector<100x8xf32> -> vector<100x8xf32>
    %82 = arith.addf %77, %81 : vector<100x8xf32>
    %c2_93 = arith.constant 2 : index
    %c0_94 = arith.constant 0 : index
    %83 = vector.load %arg10[%c2_93, %c0_94] : memref<122x8xbf16, #tpu.memory_space<vmem>>, vector<100x8xbf16>
    %c2_95 = arith.constant 2 : index
    %c0_96 = arith.constant 0 : index
    %c0_97 = arith.constant 0 : index
    %84 = vector.load %arg5[%c2_95, %c0_96, %c0_97] : memref<9x8x8xbf16, #tpu.memory_space<vmem>>, vector<1x8x8xbf16>
    %85 = vector.shape_cast %84 : vector<1x8x8xbf16> to vector<8x8xbf16>
    %cst_98 = arith.constant dense<0.000000e+00> : vector<100x8xf32>
    %86 = tpu.matmul %83, %85, %cst_98 {dimension_numbers = #tpu.dot_dimension_numbers<[1], [0], [0], [1], [0, 0, 1, 1], [], []>} : vector<100x8xbf16>, vector<8x8xbf16>, vector<100x8xf32> -> vector<100x8xf32>
    %87 = arith.addf %82, %86 : vector<100x8xf32>
    %c10_99 = arith.constant 10 : index
    %c0_100 = arith.constant 0 : index
    %88 = vector.load %arg10[%c10_99, %c0_100] : memref<122x8xbf16, #tpu.memory_space<vmem>>, vector<100x8xbf16>
    %c3_101 = arith.constant 3 : index
    %c0_102 = arith.constant 0 : index
    %c0_103 = arith.constant 0 : index
    %89 = vector.load %arg5[%c3_101, %c0_102, %c0_103] : memref<9x8x8xbf16, #tpu.memory_space<vmem>>, vector<1x8x8xbf16>
    %90 = vector.shape_cast %89 : vector<1x8x8xbf16> to vector<8x8xbf16>
    %cst_104 = arith.constant dense<0.000000e+00> : vector<100x8xf32>
    %91 = tpu.matmul %88, %90, %cst_104 {dimension_numbers = #tpu.dot_dimension_numbers<[1], [0], [0], [1], [0, 0, 1, 1], [], []>} : vector<100x8xbf16>, vector<8x8xbf16>, vector<100x8xf32> -> vector<100x8xf32>
    %92 = arith.addf %87, %91 : vector<100x8xf32>
    %c11_105 = arith.constant 11 : index
    %c0_106 = arith.constant 0 : index
    %93 = vector.load %arg10[%c11_105, %c0_106] : memref<122x8xbf16, #tpu.memory_space<vmem>>, vector<100x8xbf16>
    %c4_107 = arith.constant 4 : index
    %c0_108 = arith.constant 0 : index
    %c0_109 = arith.constant 0 : index
    %94 = vector.load %arg5[%c4_107, %c0_108, %c0_109] : memref<9x8x8xbf16, #tpu.memory_space<vmem>>, vector<1x8x8xbf16>
    %95 = vector.shape_cast %94 : vector<1x8x8xbf16> to vector<8x8xbf16>
    %cst_110 = arith.constant dense<0.000000e+00> : vector<100x8xf32>
    %96 = tpu.matmul %93, %95, %cst_110 {dimension_numbers = #tpu.dot_dimension_numbers<[1], [0], [0], [1], [0, 0, 1, 1], [], []>} : vector<100x8xbf16>, vector<8x8xbf16>, vector<100x8xf32> -> vector<100x8xf32>
    %97 = arith.addf %92, %96 : vector<100x8xf32>
    %c12 = arith.constant 12 : index
    %c0_111 = arith.constant 0 : index
    %98 = vector.load %arg10[%c12, %c0_111] : memref<122x8xbf16, #tpu.memory_space<vmem>>, vector<100x8xbf16>
    %c5_112 = arith.constant 5 : index
    %c0_113 = arith.constant 0 : index
    %c0_114 = arith.constant 0 : index
    %99 = vector.load %arg5[%c5_112, %c0_113, %c0_114] : memref<9x8x8xbf16, #tpu.memory_space<vmem>>, vector<1x8x8xbf16>
    %100 = vector.shape_cast %99 : vector<1x8x8xbf16> to vector<8x8xbf16>
    %cst_115 = arith.constant dense<0.000000e+00> : vector<100x8xf32>
    %101 = tpu.matmul %98, %100, %cst_115 {dimension_numbers = #tpu.dot_dimension_numbers<[1], [0], [0], [1], [0, 0, 1, 1], [], []>} : vector<100x8xbf16>, vector<8x8xbf16>, vector<100x8xf32> -> vector<100x8xf32>
    %102 = arith.addf %97, %101 : vector<100x8xf32>
    %c20 = arith.constant 20 : index
    %c0_116 = arith.constant 0 : index
    %103 = vector.load %arg10[%c20, %c0_116] : memref<122x8xbf16, #tpu.memory_space<vmem>>, vector<100x8xbf16>
    %c6_117 = arith.constant 6 : index
    %c0_118 = arith.constant 0 : index
    %c0_119 = arith.constant 0 : index
    %104 = vector.load %arg5[%c6_117, %c0_118, %c0_119] : memref<9x8x8xbf16, #tpu.memory_space<vmem>>, vector<1x8x8xbf16>
    %105 = vector.shape_cast %104 : vector<1x8x8xbf16> to vector<8x8xbf16>
    %cst_120 = arith.constant dense<0.000000e+00> : vector<100x8xf32>
    %106 = tpu.matmul %103, %105, %cst_120 {dimension_numbers = #tpu.dot_dimension_numbers<[1], [0], [0], [1], [0, 0, 1, 1], [], []>} : vector<100x8xbf16>, vector<8x8xbf16>, vector<100x8xf32> -> vector<100x8xf32>
    %107 = arith.addf %102, %106 : vector<100x8xf32>
    %c21 = arith.constant 21 : index
    %c0_121 = arith.constant 0 : index
    %108 = vector.load %arg10[%c21, %c0_121] : memref<122x8xbf16, #tpu.memory_space<vmem>>, vector<100x8xbf16>
    %c7_122 = arith.constant 7 : index
    %c0_123 = arith.constant 0 : index
    %c0_124 = arith.constant 0 : index
    %109 = vector.load %arg5[%c7_122, %c0_123, %c0_124] : memref<9x8x8xbf16, #tpu.memory_space<vmem>>, vector<1x8x8xbf16>
    %110 = vector.shape_cast %109 : vector<1x8x8xbf16> to vector<8x8xbf16>
    %cst_125 = arith.constant dense<0.000000e+00> : vector<100x8xf32>
    %111 = tpu.matmul %108, %110, %cst_125 {dimension_numbers = #tpu.dot_dimension_numbers<[1], [0], [0], [1], [0, 0, 1, 1], [], []>} : vector<100x8xbf16>, vector<8x8xbf16>, vector<100x8xf32> -> vector<100x8xf32>
    %112 = arith.addf %107, %111 : vector<100x8xf32>
    %c22 = arith.constant 22 : index
    %c0_126 = arith.constant 0 : index
    %113 = vector.load %arg10[%c22, %c0_126] : memref<122x8xbf16, #tpu.memory_space<vmem>>, vector<100x8xbf16>
    %c8_127 = arith.constant 8 : index
    %c0_128 = arith.constant 0 : index
    %c0_129 = arith.constant 0 : index
    %114 = vector.load %arg5[%c8_127, %c0_128, %c0_129] : memref<9x8x8xbf16, #tpu.memory_space<vmem>>, vector<1x8x8xbf16>
    %115 = vector.shape_cast %114 : vector<1x8x8xbf16> to vector<8x8xbf16>
    %cst_130 = arith.constant dense<0.000000e+00> : vector<100x8xf32>
    %116 = tpu.matmul %113, %115, %cst_130 {dimension_numbers = #tpu.dot_dimension_numbers<[1], [0], [0], [1], [0, 0, 1, 1], [], []>} : vector<100x8xbf16>, vector<8x8xbf16>, vector<100x8xf32> -> vector<100x8xf32>
    %117 = arith.addf %112, %116 : vector<100x8xf32>
    %c0_131 = arith.constant 0 : index
    %c0_132 = arith.constant 0 : index
    %118 = vector.load %arg6[%c0_131, %c0_132] : memref<1x8xf32, #tpu.memory_space<vmem>>, vector<1x8xf32>
    %119 = vector.broadcast %118 : vector<1x8xf32> to vector<100x8xf32>
    %120 = arith.addf %117, %119 : vector<100x8xf32>
    %121 = arith.addf %120, %59 : vector<100x8xf32>
    %cst_133 = arith.constant 0.000000e+00 : f32
    %122 = vector.broadcast %cst_133 : f32 to vector<100x8xf32>
    %123 = arith.maximumf %121, %122 : vector<100x8xf32>
    %c0_134 = arith.constant 0 : index
    %c0_135 = arith.constant 0 : index
    %c0_136 = arith.constant 0 : index
    %124 = vector.load %arg9[%c0_134, %c0_135, %c0_136] : memref<1x100x8xf32, #tpu.memory_space<vmem>>, vector<1x100x8xf32>
    %125 = vector.shape_cast %124 : vector<1x100x8xf32> to vector<100x8xf32>
    %126 = vector.shape_cast %123 : vector<100x8xf32> to vector<1x100x8xf32>
    tpu.vector_store %arg9[%c0_134, %c0_135, %c0_136], %126 {strides = array<i32>} : memref<1x100x8xf32, #tpu.memory_space<vmem>>, vector<1x100x8xf32>,
    return
  }
  func.func @transform_0(%arg0: i32) -> (i32, i32, i32, i32) {
    %c0_i32 = arith.constant 0 : i32
    %c0_i32_0 = arith.constant 0 : i32
    %c0_i32_1 = arith.constant 0 : i32
    %c0_i32_2 = arith.constant 0 : i32
    return %arg0, %c0_i32, %c0_i32_0, %c0_i32_1 : i32, i32, i32, i32
  }
  func.func @transform_1(%arg0: i32) -> (i32, i32) {
    %c0_i32 = arith.constant 0 : i32
    %c0_i32_0 = arith.constant 0 : i32
    %c0_i32_1 = arith.constant 0 : i32
    return %c0_i32, %c0_i32_0 : i32, i32
  }
  func.func @transform_2(%arg0: i32) -> (i32, i32, i32) {
    %c0_i32 = arith.constant 0 : i32
    %c0_i32_0 = arith.constant 0 : i32
    %c0_i32_1 = arith.constant 0 : i32
    %c0_i32_2 = arith.constant 0 : i32
    return %c0_i32, %c0_i32_0, %c0_i32_1 : i32, i32, i32
  }
  func.func @transform_3(%arg0: i32) -> (i32, i32) {
    %c0_i32 = arith.constant 0 : i32
    %c0_i32_0 = arith.constant 0 : i32
    %c0_i32_1 = arith.constant 0 : i32
    return %c0_i32, %c0_i32_0 : i32, i32
  }
  func.func @transform_4(%arg0: i32) -> (i32, i32, i32) {
    %c0_i32 = arith.constant 0 : i32
    %c0_i32_0 = arith.constant 0 : i32
    %c0_i32_1 = arith.constant 0 : i32
    %c0_i32_2 = arith.constant 0 : i32
    return %c0_i32, %c0_i32_0, %c0_i32_1 : i32, i32, i32
  }
  func.func @transform_5(%arg0: i32) -> (i32, i32) {
    %c0_i32 = arith.constant 0 : i32
    %c0_i32_0 = arith.constant 0 : i32
    %c0_i32_1 = arith.constant 0 : i32
    return %c0_i32, %c0_i32_0 : i32, i32
  }
  func.func @transform_6(%arg0: i32) -> (i32, i32) {
    %c0_i32 = arith.constant 0 : i32
    %c0_i32_0 = arith.constant 0 : i32
    %c0_i32_1 = arith.constant 0 : i32
    return %c0_i32, %c0_i32_0 : i32, i32
  }
  func.func @transform_7(%arg0: i32) -> (i32, i32) {
    %c0_i32 = arith.constant 0 : i32
    %c0_i32_0 = arith.constant 0 : i32
    %c0_i32_1 = arith.constant 0 : i32
    return %c0_i32, %c0_i32_0 : i32, i32
  }
  func.func @transform_8(%arg0: i32) -> (i32, i32, i32) {
    %c0_i32 = arith.constant 0 : i32
    %c0_i32_0 = arith.constant 0 : i32
    %c0_i32_1 = arith.constant 0 : i32
    return %arg0, %c0_i32, %c0_i32_0 : i32, i32, i32
  }
}

</mosaic_0001>

<bundles_post_ra>
// kernel: basic_block_forward.1
= control target key start
LH: loop header
LB: loop body
LE: loop exit
PB: predicated region body
PF: predicated region fallthrough
CT: control target
= control target key end

     0   :  { %s3722_s27 = smov 0   ;;  %s4874_s0 = inlined_call_operand.vmem [shape: bf16[2,4,111,4], index: 0, kind: input, shape index: {}]   ;;  %s4875_s1 = inlined_call_operand.vmem [shape: f32[100,1], index: 1, kind: input, shape index: {}]   ;;  %s4876_s2 = inlined_call_operand.vmem [shape: bf16[9,4,8], index: 2, kind: input, shape index: {}]   ;;  %s4877_s3 = inlined_call_operand.vmem [shape: f32[1,8], index: 3, kind: input, shape index: {}]   ;;  %s4878_s4 = inlined_call_operand.vmem [shape: bf16[9,8,8], index: 4, kind: input, shape index: {}]   ;;  %s4879_s5 = inlined_call_operand.vmem [shape: f32[1,8], index: 5, kind: input, shape index: {}]   ;;  %s4880_s6 = inlined_call_operand.vmem [shape: bf16[4,8], index: 6, kind: input, shape index: {}]   ;;  %s4881_s7 = inlined_call_operand.vmem [shape: f32[1,8], index: 7, kind: input, shape index: {}]   ;;  %s4882_s8 = inlined_call_operand.vmem [shape: f32[2,100,8], index: 8, kind: output, shape index: {}]  }
   0x1 LB: > { %s3140_s28 = sadd.s32 4294967295, %s3674_s27   ;;  %p3144_p0 = scmp.ge.s32.totalorder %s3674_s27, 1  ;;  %s3674_s27 = sphi %s3722_s27, %s18_s27  }
   0x2   : > { %p262_p1 = scmp.lt.s32.totalorder %s3674_s27, 3 }
   0x4   : > { %p263_p2 = pnand %p3144_p0, %p262_p1 }
   0x5   : > { %p296_p3 = scmp.lt.s32.totalorder (!%p263_p2), %s3140_s28, 1 }
   0x6   : > { %266 = sbr.rel (%p263_p2) target bundleno = 868 (0x364), region = 52 }
   0xb   : > { %v3160_v0 = vld [vmem:[%s4876_s2 + $0x2] sm:$0x3]  ;;  %vm392_vm0 = vcmask 1041408   ;;  %v3244_v2 = vld [vmem:[%s4876_s2 + $0x6] sm:$0x3]  ;;  %s4886_s28 = smov (!%p296_p3, %s3140_s28), 1 }
   0xc   : > { %v394_v1 = vsel %vm392_vm0, %v3160_v0, 0  ;;  %v320_v3 = vld [vmem:[%s4876_s2] sm:$0x3]  ;;  %v746_v4 = vsel %vm392_vm0, %v3244_v2, 0  ;;  %v3223_v6 = vld [vmem:[%s4876_s2 + $0x4] sm:$0x3] }
   0xd   : > { %3648 = vmatpush.bf16.msra.mxu3 %v394_v1  ;;  %v494_v5 = vsel %vm392_vm0, %v320_v3, 0  ;;  %403 = vmatpush.bf16.msra.mxu0 %v394_v1  ;;  %v617_v7 = vsel %vm392_vm0, %v3223_v6, 0  ;;  %s3651_s15 = smul.u32 224, %s4886_s28  ;;  %vm370_vm1 = vcmask 31744   ;;  %vm545_vm2 = vsmask.f32 7424 }
   0xe   : > { %3649 = vmatpush.bf16.msra.mxu1 %v494_v5  ;;  %3650 = vmatpush.bf16.msra.mxu2 %v617_v7  ;;  %v3289_v49 = vld [vmem:[%s4876_s2 + $0x8] sm:$0x3]  ;;  %v3375_v57 = vld [vmem:[%s4876_s2 + $0xe] sm:$0x3]  ;;  %v3330_v58 = vld [vmem:[%s4876_s2 + $0xc] sm:$0x3] }
   0xf   : > { %s3752_s18 = scalar_lea.vmem %s4874_s0, %s3651_s15  ;;  %v875_v50 = vsel %vm392_vm0, %v3289_v49, 0  ;;  %v3322_v59 = vld [vmem:[%s4876_s2 + $0xa] sm:$0x3]  ;;  %v1293_v60 = vsel %vm392_vm0, %v3375_v57, 0  ;;  %v1152_v61 = vsel %vm392_vm0, %v3330_v58, 0  ;;  %vm1116_vm3 = vcmask 1046528  }
  0x10   : > { %v3590_v8 = vld [vmem:[%s3752_s18 + $0x40] sm:$0xff]  ;;  %v3584_v9 = vld [vmem:[%s3752_s18 + $0x8] sm:$0xff]  ;;  %v3585_v10 = vld [vmem:[%s3752_s18 + $0x10] sm:$0xff]  ;;  %v1010_v62 = vsel %vm392_vm0, %v3322_v59, 0  ;;  %vm1672_vm4 = vcmask 60416   ;;  %vm1687_vm5 = vcmask 57344  }
  0x11   : > { %755 = vmatpush.bf16.msrb.mxu3 %v746_v4  ;;  %503 = vmatpush.bf16.msrb.mxu0 %v494_v5  ;;  %v3589_v11 = vld [vmem:[%s3752_s18 + $0x38] sm:$0xff]  ;;  %v552_v12 = vshll.u32 %v3584_v9, 16  ;;  %v556_v13 = vshrl.u32 %v3584_v9, 16  ;;  %v559_v14 = vshll.u32 %v3585_v10, 16  ;;  %v3591_v20 = vld [vmem:[%s3752_s18 + $0x48] sm:$0xff]  ;;  %v563_v21 = vshrl.u32 %v3585_v10, 16 }
  0x12   : > { %3186 = vmatmul.msk.bf16.vlgmr.msra.gmra.mxu3 %vm370_vm1, %v3590_v8  ;;  %3217 = vmatmul.msk.bf16.vlgmr.msra.gmra.mxu1 %vm370_vm1, %v3584_v9  ;;  %v3586_v19 = vld [vmem:[%s3752_s18 + $0x18] sm:$0xff]  ;;  %v3583_v23 = vld [vmem:[%s3752_s18] sm:$0xff]  ;;  %v3592_v32 = vld [vmem:[%s3752_s18 + $0x50] sm:$0xff]  ;;  %vm1357_vm6 = vsmask.f32 6400  ;;  %vm1995_vm7 = vcmask 1043456  }
  0x13   : > { %3185 = vmatmul.msk.bf16.vlgmr.msra.gmra.mxu0 %vm370_vm1, %v3589_v11  ;;  %v554_v15 = vrot.slane %v552_v12, 1  ;;  %v561_v16 = vrot.slane %v559_v14, 1  ;;  %v566_v22 = vshll.u32 %v3586_v19, 16  ;;  %v548_v26 = vshll.u32 %v3583_v23, 16  ;;  %v3587_v30 = vld [vmem:[%s3752_s18 + $0x20] sm:$0xff]  ;;  %v3588_v39 = vld [vmem:[%s3752_s18 + $0x28] sm:$0xff]  ;;  %1161 = vmatpush.bf16.msrb.mxu2 %v1152_v61 }
  0x14   : > { %v546_v28 = vshrl.u32 %v3583_v23, 16  ;;  %v570_v33 = vshrl.u32 %v3586_v19, 16  ;;  %v573_v34 = vshll.u32 %v3587_v30, 16  ;;  %v3593_v40 = vld [vmem:[%s3752_s18 + $0x58] sm:$0xff]  ;;  %v577_v41 = vshrl.u32 %v3587_v30, 16  ;;  %v3594_v52 = vld [vmem:[%s3752_s18 + $0x60] sm:$0xff]  ;;  %1019 = vmatpush.bf16.msrb.mxu1 %v1010_v62 }
  0x15   : > { %626 = vmatpush.bf16.msra.mxu0 %v617_v7  ;;  %v558_v17 = vor.u32 %v556_v13, %v554_v15  ;;  %v565_v24 = vor.u32 %v563_v21, %v561_v16  ;;  %v568_v25 = vrot.slane %v566_v22, 1  ;;  %v550_v29 = vrot.slane %v548_v26, 1  ;;  %v539_v45 = vld [vmem:[%s3752_s18 + $0x30] sm:$0x7]  ;;  %v3792_v54 = vld [vmem:[%s3752_s18 + $0xa8] sm:$0xff]  ;;  %1302 = vmatpush.bf16.msra.mxu3 %v1293_v60  ;;  %v3596_v11 = vld [vmem:[%s3752_s18 + $0x78] sm:$0xff] }
  0x16   : > { %v575_v37 = vrot.slane %v573_v34, 1  ;;  %v580_v42 = vshll.u32 %v3588_v39, 16  ;;  %v543_v46 = vunpack.c.l.b16 %v539_v45  ;;  %v584_v53 = vshrl.u32 %v3588_v39, 16  ;;  %v3159_v0 = vld [vmem:[%s3752_s18 + $0x68] sm:$0x3]  ;;  %v3819_v8 = vld [vmem:[%s3752_s18 + $0xb0] sm:$0xff] }
  0x17   : > { %v562_v18 = vsel %vm545_vm2, %v558_v17, %v561_v16  ;;  %v569_v27 = vsel %vm545_vm2, %v565_v24, %v568_v25  ;;  %v551_v31 = vor.u32 %v550_v29, %v546_v28  ;;  %v572_v36 = vor.u32 %v570_v33, %v568_v25  ;;  %v319_v1 = vld [vmem:[%s3752_s18 + $0x30] sm:$0x3]  ;;  %v3333_v17 = vld [vmem:[%s3752_s18 + $0x4] sm:$0xe]  ;;  %v3837_v24 = vld [vmem:[%s3752_s18 + $0xb8] sm:$0xff]  ;;  %s3652_s22 = smul.u32 104, %s4886_s28 }
  0x18   : > { %3225 = vmatmul.msk.bf16.vlgmr.msra.gmra.mxu2 %vm370_vm1, %v562_v18  ;;  %v579_v43 = vor.u32 %v577_v41, %v575_v37  ;;  %v582_v44 = vrot.slane %v580_v42, 1  ;;  %v544_v48 = vpack.c.b16 %v543_v46, %v543_v46  ;;  %v3407_v2 = vld [vmem:[%s4876_s2 + $0x10] sm:$0x3]  ;;  %v362_v3 = vunpack.c.l.b16 %v3159_v0  ;;  %v3607_v18 = vld [vmem:[%s3752_s18 + $0x4] sm:$0xf0]  ;;  %v3849_v33 = vld [vmem:[%s3752_s18 + $0x14] sm:$0xff] }
  0x19   : > { %v555_v35 = vsel %vm545_vm2, %v551_v31, %v554_v15  ;;  %v576_v38 = vsel %vm545_vm2, %v572_v36, %v575_v37  ;;  %v464_v4 = vunpack.c.l.b16 %v319_v1  ;;  %v1442_v5 = vsel %vm392_vm0, %v3407_v2, 0  ;;  %v3831_v21 = vld [vmem:[%s3752_s18 + $0xc] sm:$0xff]  ;;  %v3883_v0 = vld [vmem:[%s3752_s18 + $0x24] sm:$0xff]  ;;  %s4795_s25 = scalar_lea.vmem %s4882_s8, %s3652_s22 }
  0x1a   : > { %v583_v47 = vsel %vm545_vm2, %v579_v43, %v582_v44  ;;  %v588_v51 = vshll.u32 %v544_v48, 16  ;;  %v586_v56 = vor.u32 %v584_v53, %v582_v44  ;;  %v369_v6 = vpack.c.b16 %v362_v3, %v362_v3  ;;  %v3598_v37 = vld [vmem:[%s3752_s18 + $0x88] sm:$0xff]  ;;  %v3864_v43 = vld [vmem:[%s3752_s18 + $0x1c] sm:$0xff]  ;;  %v3599_v49 = vld [vmem:[%s3752_s18 + $0x90] sm:$0xff] }
  0x1b   : > { %v471_v7 = vpack.c.b16 %v464_v4, %v464_v4  ;;  %v592_v9 = vshrl.u32 %v544_v48, 16  ;;  %v945_v16 = vshll.u32 %v3596_v11, 16  ;;  %v3833_v22 = vor.u32 %v3607_v18, %v3333_v17  ;;  %v3887_v4 = vld [vmem:[%s3752_s18 + $0xd0] sm:$0xff] }
  0x1c   : > { %v590_v55 = vrot.slane %v588_v51, 1  ;;  %v1118_v26 = vrot.slane %v3831_v21, 1  ;;  %v949_v29 = vshrl.u32 %v3596_v11, 16  ;;  %v1120_v36 = vrot.slane %v3849_v33, 1 }
  0x1d   : > { %v1117_v25 = vrot.slane %v3833_v22, 1  ;;  %v1122_v48 = vrot.slane %v3864_v43, 1  ;;  %vm1674_vm8 = vcmask 58368   ;;  %vm1675_vm9 = vsmask.f32 1280 }
  0x1e   : > { %v591_v63 = vsel %vm545_vm2, %v586_v56, %v590_v55  ;;  %v594_v13 = vor.u32 %v592_v9, %v590_v55  ;;  %v963_v55 = vshrl.u32 %v3598_v37, 16  ;;  %v966_v56 = vshll.u32 %v3599_v49, 16  ;;  %vm1676_vm10 = vmand %vm1674_vm8, %vm1675_vm9 }
  0x1f   : > { %v1119_v28 = vsel %vm1116_vm3, %v1117_v25, %v1118_v26  ;;  %vm1845_vm11 = vcmask 60417   ;;  %vm1846_vm12 = vsmask.f32 7942  ;;  %vm1702_vm14 = vsmask.f32 5392 }
  0x20   : > { %v968_v59 = vrot.slane %v966_v56, 1  ;;  %v1367_v56 = vshrl.u32 %v3831_v21, 16  ;;  %vm1847_vm13 = vmand %vm1845_vm11, %vm1846_vm12  ;;  %vm1680_vm8 = vcmask 60419   ;;  %vm1863_vm11 = vsmask.f32 3328 }
  0x21   : > { %vm4217_vm15 = vmor %vm1675_vm9, %vm1702_vm14  ;;  %vm1681_vm9 = vsmask.f32 7950 }
  0x22   : > { %3187 = vmatmul.msk.bf16.gmra.mxu3 %vm370_vm1, %v3591_v20  ;;  %3218 = vmatmul.msk.bf16.gmra.mxu1 %vm370_vm1, %v3585_v10  ;;  %v3595_v10 = vld [vmem:[%s3752_s18 + $0x70] sm:$0xff]  ;;  %v947_v20 = vrot.slane %v945_v16, 1  ;;  %vm1864_vm12 = vmand %vm1672_vm4, %vm1863_vm11 }
  0x23   : > { %3216 = vmatmul.msk.bf16.vlgmr.msrb.gmra.mxu0 %vm370_vm1, %v3583_v23  ;;  %v941_v12 = vshll.u32 %v3595_v10, 16  ;;  %v939_v14 = vshrl.u32 %v3595_v10, 16 }
  0x24   : > { %884 = vmatpush.bf16.msrb.mxu0 %v875_v50  ;;  %v951_v31 = vor.u32 %v949_v29, %v947_v20 }
  0x25   : > { %v943_v15 = vrot.slane %v941_v12, 1 }
  0x28   : > { %3226 = vmatmul.msk.bf16.gmra.mxu2 %vm370_vm1, %v569_v27  ;;  %v3597_v27 = vld [vmem:[%s3752_s18 + $0x80] sm:$0xff] }
  0x32   : > { %3188 = vmatmul.msk.bf16.gmra.mxu3 %vm370_vm1, %v3592_v32  ;;  %3219 = vmatmul.msk.bf16.gmra.mxu1 %vm370_vm1, %v3586_v19  ;;  %v944_v19 = vor.u32 %v943_v15, %v939_v14  ;;  %v970_v15 = vshrl.u32 %v3599_v49, 16 }
  0x33   : > { %3224 = vmatmul.msk.bf16.vlgmr.msra.gmra.mxu0 %vm370_vm1, %v555_v35  ;;  %v3853_v35 = vld [vmem:[%s3752_s18 + $0xc0] sm:$0xff] }
  0x34   : > { %1451 = vmatpush.bf16.msra.mxu0 %v1442_v5  ;;  %v948_v23 = vsel %vm545_vm2, %v944_v19, %v947_v20  ;;  %v972_v18 = vor.u32 %v970_v15, %v968_v59 }
  0x38   : > { %3227 = vmatmul.msk.bf16.gmra.mxu2 %vm370_vm1, %v576_v38  ;;  %v1121_v38 = vsel %vm1116_vm3, %v1118_v26, %v1120_v36 }
  0x42   : > { %3189 = vmatmul.msk.bf16.gmra.mxu3 %vm370_vm1, %v3593_v40  ;;  %3220 = vmatmul.msk.bf16.gmra.mxu1 %vm370_vm1, %v3587_v30  ;;  %v952_v30 = vshll.u32 %v3597_v27, 16  ;;  %v959_v40 = vshll.u32 %v3598_v37, 16 }
  0x43   : > { %3314 = vmatmul.msk.bf16.vlgmr.msrb.gmra.mxu0 %vm370_vm1, %v3792_v54 }
  0x44   : > { %v954_v32 = vrot.slane %v952_v30, 1  ;;  %v961_v42 = vrot.slane %v959_v40, 1 }
  0x46   : > { %v955_v34 = vsel %vm545_vm2, %v951_v31, %v954_v32  ;;  %v965_v58 = vor.u32 %v963_v55, %v961_v42  ;;  %v1362_v55 = vshll.u32 %v3833_v22, 16 }
  0x48   : > { %3228 = vmatmul.msk.bf16.gmra.mxu2 %vm370_vm1, %v583_v47  ;;  %v3868_v47 = vld [vmem:[%s3752_s18 + $0xc8] sm:$0xff]  ;;  %v969_v2 = vsel %vm545_vm2, %v965_v58, %v968_v59  ;;  %v1370_v59 = vshll.u32 %v3831_v21, 16  ;;  %v1369_v21 = vrot.slane %v1367_v56, 1 }
  0x52   : > { %3190 = vmatmul.msk.bf16.gmra.mxu3 %vm370_vm1, %v3594_v52  ;;  %3221 = vmatmul.msk.bf16.gmra.mxu1 %vm370_vm1, %v3588_v39  ;;  %v956_v39 = vshrl.u32 %v3597_v27, 16  ;;  %v1123_v52 = vsel %vm1116_vm3, %v1120_v36, %v1122_v48 }
  0x53   : > { %3315 = vmatmul.msk.bf16.gmra.mxu0 %vm370_vm1, %v3819_v8 }
  0x54   : > { %v958_v41 = vor.u32 %v956_v39, %v954_v32 }
  0x56   : > { %v962_v45 = vsel %vm545_vm2, %v958_v41, %v961_v42 }
  0x58   : > { %3229 = vmatmul.msk.bf16.gmra.mxu2 %vm370_vm1, %v591_v63 }
  0x62   : > { %3191 = vmatmul.msk.bf16.gmra.mxu3 %vm370_vm1, %v369_v6  ;;  %3222 = vmatmul.msk.bf16.gmra.mxu1 %vm370_vm1, %v471_v7  ;;  %v1124_v6 = vrot.slane %v3883_v0, 1  ;;  %v3893_v7 = vld [vmem:[%s3752_s18 + $0x98] sm:$0xff] }
  0x63   : > { %3316 = vmatmul.msk.bf16.gmra.mxu0 %vm370_vm1, %v3837_v24  ;;  %v973_v16 = vshll.u32 %v3893_v7, 16 }
  0x65   : > { %v975_v19 = vrot.slane %v973_v16, 1 }
  0x67   : > { %v976_v31 = vsel %vm545_vm2, %v972_v18, %v975_v19 }
  0x68   : > { %3230 = vmatmul.msk.bf16.gmra.mxu2 %vm370_vm1, %v594_v13  ;;  %v1125_v13 = vsel %vm1116_vm3, %v1122_v48, %v1124_v6  ;;  %v1080_v48 = vld [vmem:[%s3752_s18 + $0x34] sm:$0x7] }
  0x72   : > { %3269 = vmatmul.msk.bf16.vlgmr.msrb.gmra.mxu3 %vm370_vm1, %v3595_v10  ;;  %3323 = vmatmul.msk.bf16.vlgmr.msrb.gmra.mxu1 %vm370_vm1, %v948_v23  ;;  %v3321_v23 = vld [vmem:[%s3752_s18 + $0xa0] sm:$0x7] }
  0x73   : > { %3317 = vmatmul.msk.bf16.gmra.mxu0 %vm370_vm1, %v3853_v35  ;;  %v937_v32 = vunpack.c.l.b16 %v3321_v23  ;;  %v1582_v23 = vld [vmem:[%s4875_s1 + $0x8] sm:$0xff] }
  0x75   : > { %v3923_v39 = vpack.c.b16 %v937_v32, %v937_v32  ;;  %v1376_v32 = vshrl.u32 %v3849_v33, 16 }
  0x78   : > { %3355 = vmatmul.msk.bf16.vlgmr.msrb.gmra.mxu2 %vm370_vm1, %v1119_v28  ;;  %v3913_v28 = vld [vmem:[%s3752_s18 + $0x2c] sm:$0xff] }
  0x82   : > { %3270 = vmatmul.msk.bf16.gmra.mxu3 %vm370_vm1, %v3596_v11  ;;  %3324 = vmatmul.msk.bf16.gmra.mxu1 %vm370_vm1, %v955_v34 }
  0x83   : > { %3318 = vmatmul.msk.bf16.gmra.mxu0 %vm370_vm1, %v3868_v47 }
  0x88   : > { %3356 = vmatmul.msk.bf16.gmra.mxu2 %vm370_vm1, %v1121_v38  ;;  %v1126_v38 = vrot.slane %v3913_v28, 1 }
  0x8f   : > { %v510_v44 = vpop.f32.mrf.mxu1 }
  0x90   : > { %v405_v46 = vpop.f32.mrf.mxu0 }
  0x92   : > { %3271 = vmatmul.msk.bf16.gmra.mxu3 %vm370_vm1, %v3597_v27  ;;  %3325 = vmatmul.msk.bf16.gmra.mxu1 %vm370_vm1, %v962_v45  ;;  %v3288_v27 = vld [vmem:[%s3752_s18 + $0xd8] sm:$0x3]  ;;  %v977_v45 = vshrl.u32 %v3893_v7, 16 }
  0x93   : > { %3319 = vmatmul.msk.bf16.gmra.mxu0 %vm370_vm1, %v3887_v4  ;;  %v845_v29 = vunpack.c.l.b16 %v3288_v27  ;;  %v3243_v27 = vld [vmem:[%s3752_s18 + $0xa0] sm:$0x3] }
  0x95   : > { %v410_v50 = vpop.f32.mrf.mxu3  ;;  %v3916_v36 = vpack.c.b16 %v845_v29, %v845_v29 }
  0x96   : > { %v511_v51 = vadd.f32 %v510_v44, %v410_v50  ;;  %v1127_v44 = vsel %vm1116_vm3, %v1124_v6, %v1126_v38  ;;  %v1108_v50 = vunpack.c.l.b16 %v1080_v48  ;;  %v3676_v6 = vmov 0  }
  0x97   : > { %v512_v53 = vpop.f32.mrf.mxu1  ;;  %3662 = vset.pattern.permute.xlu0 %v3676_v6  ;;  %1673 = vst.msk [vmem:[#allocation2] sm:$0xf] %vm1672_vm4, %v3676_v6  ;;  %3663 = vset.pattern.permute.xlu1 %v3676_v6 }
  0x98   : > { %v3877_v57 = vpop.f32.mrf.mxu0  ;;  %3357 = vmatmul.msk.bf16.gmra.mxu2 %vm370_vm1, %v1123_v52  ;;  %1686 = vst.msk [vmem:[#allocation2 + $0x38] sm:$0xf] %vm1672_vm4, %v3676_v6  ;;  %3664 = vset.pattern.permute.xlu2 %v3676_v6 }
  0x99   : > { %1688 = vst.msk [vmem:[#allocation2 + $0x3c] sm:$0x1] %vm1687_vm5, %v3676_v6  ;;  %v1584_v6 = vld [vmem:[%s4875_s1 + $0x18] sm:$0xff]  ;;  %vm2935_vm5 = vcmask 1044480  }
  0x9b   : > { %v633_v60 = vpop.f32.mrf.mxu2 }
  0x9c   : > { %v3880_v61 = vadd.f32 %v633_v60, %v511_v51  ;;  %v979_v51 = vor.u32 %v977_v45, %v975_v19  ;;  %v1378_v45 = vrot.slane %v1376_v32, 1 }
  0x9d   : > { %v412_v62 = vpop.f32.mrf.mxu3 }
  0x9e   : > { %v513_v63 = vadd.f32 %v512_v53, %v412_v62  ;;  %v1359_v53 = vshrl.u32 %v3833_v22, 16 }
  0x9f   : > { %v515_v1 = vpop.f32.mrf.mxu1 }
  0xa0   : > { %v505_v3 = vpop.f32.mrf.mxu0 }
  0xa1   : > { %v506_v5 = vadd.f32 %v505_v3, %v405_v46  ;;  %v1581_v3 = vld [vmem:[%s4875_s1] sm:$0xff] }
  0xa2   : > { %3272 = vmatmul.msk.bf16.gmra.mxu3 %vm370_vm1, %v3598_v37  ;;  %3326 = vmatmul.msk.bf16.gmra.mxu1 %vm370_vm1, %v969_v2  ;;  %v3944_v2 = vpack.c.b16 %v1108_v50, %v1108_v50 }
  0xa3   : > { %v635_v9 = vpop.f32.mrf.mxu2  ;;  %3320 = vmatmul.msk.bf16.gmra.mxu0 %vm370_vm1, %v3916_v36  ;;  %1596 = vperm.xlu0 %3662, %v1581_v3   ;;  %v3614_v3 = vld [vmem:[%s3752_s18 + $0x44] sm:$0xff] }
  0xa4   : > { %v3897_v10 = vadd.f32 %v635_v9, %v513_v63  ;;  %v1361_v63 = vrot.slane %v1359_v53, 1 }
  0xa5   : > { %v415_v11 = vpop.f32.mrf.mxu3 }
  0xa6   : > { %v516_v12 = vadd.f32 %v515_v1, %v415_v11  ;;  %v1364_v1 = vrot.slane %v1362_v55, 2  ;;  %v1372_v11 = vrot.slane %v1370_v59, 2  ;;  %v1583_v55 = vld [vmem:[%s4875_s1 + $0x10] sm:$0xff] }
  0xa7   : > { %v3900_v14 = vpop.f32.mrf.mxu1  ;;  %1606 = vperm.xlu1 %3663, %v1583_v55   ;;  %v1397_v55 = vshll.u32 %v3883_v0, 16 }
  0xa8   : > { %v3903_v17 = vpop.f32.mrf.mxu0  ;;  %3358 = vmatmul.msk.bf16.gmra.mxu2 %vm370_vm1, %v1125_v13  ;;  %v1365_v9 = vor.u32 %v1364_v1, %v1361_v63  ;;  %v1373_v13 = vor.u32 %v1372_v11, %v1369_v21  ;;  %v1590_v1 = vld [vmem:[%s4875_s1 + $0x48] sm:$0xff]  ;;  %v1385_v11 = vshrl.u32 %v3864_v43, 16 }
  0xaa   : > { %v1374_v16 = vsel %vm1357_vm6, %v1365_v9, %v1373_v13  ;;  %v1259_v9 = vrot.slane %v3614_v3, 1 }
  0xab   : > { %v638_v20 = vpop.f32.mrf.mxu2  ;;  %1601 = vperm.xlu0 %3662, %v1582_v23  }
  0xac   : > { %v3907_v25 = vadd.f32 %v638_v20, %v516_v12  ;;  %v1128_v12 = vrot.slane %v3944_v2, 1 }
  0xad   : > { %v3909_v26 = vpop.f32.mrf.mxu3 }
  0xae   : > { %v1129_v20 = vsel %vm1116_vm3, %v1126_v38, %v1128_v12 }
  0xaf   : > { %v520_v30 = vpop.f32.mrf.mxu1  ;;  %1611 = vperm.xlu1 %3663, %v1584_v6  }
  0xb0   : > { %v628_v34 = vpop.f32.mrf.mxu0 }
  0xb1   : > { %v3918_v37 = vadd.f32 %v628_v34, %v506_v5  ;;  %v1379_v34 = vshll.u32 %v3849_v33, 16 }
  0xb2   : > { %3273 = vmatmul.msk.bf16.gmra.mxu3 %vm370_vm1, %v3599_v49  ;;  %3327 = vmatmul.msk.bf16.gmra.mxu1 %vm370_vm1, %v976_v31  ;;  %v981_v49 = vshll.u32 %v3923_v39, 16  ;;  %v985_v31 = vshrl.u32 %v3923_v39, 16 }
  0xb3   : > { %v3927_v40 = vpop.f32.mrf.mxu2  ;;  %3408 = vmatmul.msk.bf16.vlgmr.msra.gmra.mxu0 %vm370_vm1, %v1374_v16  ;;  %v1381_v48 = vrot.slane %v1379_v34, 2  ;;  %v1588_v34 = vld [vmem:[%s4875_s1 + $0x38] sm:$0xff] }
  0xb4   : > { %v983_v52 = vrot.slane %v981_v49, 1 }
  0xb5   : > { %v420_v41 = vpop.f32.mrf.mxu3 }
  0xb6   : > { %v521_v42 = vadd.f32 %v520_v30, %v420_v41  ;;  %v984_v5 = vsel %vm545_vm2, %v979_v51, %v983_v52  ;;  %v716_v30 = vunpack.c.l.b16 %v3243_v27  ;;  %v987_v50 = vor.u32 %v985_v31, %v983_v52  ;;  %v3378_v52 = vld [vmem:[%s3752_s18 + $0x3c] sm:$0xe] }
  0xb7   : > { %v3931_v46 = vpop.f32.mrf.mxu1  ;;  %v1382_v51 = vor.u32 %v1381_v48, %v1378_v45  ;;  %1631 = vperm.xlu1 %3663, %v1588_v34   ;;  %v1403_v34 = vshrl.u32 %v3913_v28, 16 }
  0xb8   : > { %3359 = vmatmul.msk.bf16.gmra.mxu2 %vm370_vm1, %v1127_v44  ;;  %v3967_v29 = vpop.f32.mrf.mxu0  ;;  %v1587_v44 = vld [vmem:[%s4875_s1 + $0x30] sm:$0xff]  ;;  %v723_v49 = vpack.c.b16 %v716_v30, %v716_v30 }
  0xb9   : > { %1626 = vperm.xlu0 %3662, %v1587_v44   ;;  %v1383_v33 = vsel %vm1357_vm6, %v1373_v13, %v1382_v51  ;;  %v1388_v13 = vshll.u32 %v3864_v43, 16 }
  0xbb   : > { %v643_v58 = vpop.f32.mrf.mxu2  ;;  %v1390_v23 = vrot.slane %v1388_v13, 2 }
  0xbc   : > { %v3940_v60 = vadd.f32 %v643_v58, %v521_v42  ;;  %v3613_v58 = vld [vmem:[%s3752_s18 + $0x3c] sm:$0xf0] }
  0xbd   : > { %v3942_v62 = vpop.f32.mrf.mxu3 }
  0xbf   : > { %v525_v22 = vpop.f32.mrf.mxu1 }
  0xc0   : > { %v3980_v53 = vpop.f32.mrf.mxu0 }
  0xc1   : > { %1641 = vperm.xlu0 %3662, %v1590_v1   ;;  %v1399_v1 = vrot.slane %v1397_v55, 2 }
  0xc2   : > { %3274 = vmatmul.msk.bf16.gmra.mxu3 %vm370_vm1, %v3893_v7  ;;  %3328 = vmatmul.msk.bf16.gmra.mxu1 %vm370_vm1, %v984_v5 }
  0xc3   : > { %v3956_v15 = vpop.f32.mrf.mxu2  ;;  %3409 = vmatmul.msk.bf16.gmra.mxu0 %vm370_vm1, %v1383_v33  ;;  %v1394_v33 = vshrl.u32 %v3883_v0, 16 }
  0xc5   : > { %v425_v18 = vpop.f32.mrf.mxu3 }
  0xc6   : > { %v526_v19 = vadd.f32 %v525_v22, %v425_v18  ;;  %v3379_v22 = vor.u32 %v3613_v58, %v3378_v52 }
  0xc7   : > { %v3964_v7 = vpop.f32.mrf.mxu1 }
  0xc8   : > { %3360 = vmatmul.msk.bf16.gmra.mxu2 %vm370_vm1, %v1129_v20  ;;  %v3999_v5 = vpop.f32.mrf.mxu0  ;;  %v1258_v21 = vrot.slane %v3379_v22, 1  ;;  %v1387_v20 = vrot.slane %v1385_v11, 1 }
  0xca   : > { %v1260_v27 = vsel %vm1116_vm3, %v1258_v21, %v1259_v9  ;;  %v1391_v31 = vor.u32 %v1390_v23, %v1387_v20  ;;  %v3616_v23 = vld [vmem:[%s3752_s18 + $0x54] sm:$0xff] }
  0xcb   : > { %v648_v38 = vpop.f32.mrf.mxu2 }
  0xcc   : > { %v3973_v41 = vadd.f32 %v648_v38, %v526_v19  ;;  %v1392_v43 = vsel %vm1357_vm6, %v1382_v51, %v1391_v31 }
  0xcd   : > { %v3975_v42 = vpop.f32.mrf.mxu3 }
  0xcf   : > { %v530_v39 = vpop.f32.mrf.mxu1 }
  0xd0   : > { %v4015_v32 = vpop.f32.mrf.mxu0 }
  0xd2   : > { %3275 = vmatmul.msk.bf16.gmra.mxu3 %vm370_vm1, %v723_v49  ;;  %3329 = vmatmul.msk.bf16.gmra.mxu1 %vm370_vm1, %v987_v50  ;;  %v3615_v49 = vld [vmem:[%s3752_s18 + $0x4c] sm:$0xff] }
  0xd3   : > { %v3988_v56 = vpop.f32.mrf.mxu2  ;;  %3410 = vmatmul.msk.bf16.gmra.mxu0 %vm370_vm1, %v1392_v43  ;;  %v1261_v51 = vrot.slane %v3615_v49, 1  ;;  %v1263_v43 = vrot.slane %v3616_v23, 1 }
  0xd5   : > { %v430_v59 = vpop.f32.mrf.mxu3  ;;  %v1262_v3 = vsel %vm1116_vm3, %v1259_v9, %v1261_v51  ;;  %v508_v9 = vadd.f32 %v3903_v17, %v3877_v57  ;;  %v1405_v17 = vrot.slane %v1403_v34, 1 }
  0xd6   : > { %v531_v63 = vadd.f32 %v530_v39, %v430_v59  ;;  %v1591_v39 = vld [vmem:[%s4875_s1 + $0x50] sm:$0xff] }
  0xd7   : > { %v3996_v2 = vpop.f32.mrf.mxu1  ;;  %1646 = vperm.xlu1 %3663, %v1591_v39   ;;  %v1264_v39 = vsel %vm1116_vm3, %v1261_v51, %v1263_v43 }
  0xd8   : > { %3361 = vmatmul.msk.bf16.gmra.mxu2 %vm370_vm1, %v1128_v12  ;;  %v1593_v12 = vld [vmem:[%s4875_s1 + $0x60] sm:$0xf]  ;;  %v4026_v50 = vpop.f32.mrf.mxu0 }
  0xd9   : > { %1656 = vperm.xlu0 %3662, %v1593_v12  }
  0xdb   : > { %v653_v16 = vpop.f32.mrf.mxu2 }
  0xdc   : > { %v4007_v18 = vadd.f32 %v653_v16, %v531_v63  ;;  %v1396_v63 = vrot.slane %v1394_v33, 1 }
  0xdd   : > { %v4009_v19 = vpop.f32.mrf.mxu3 }
  0xde   : > { %v1400_v6 = vor.u32 %v1399_v1, %v1396_v63 }
  0xdf   : > { %v535_v30 = vpop.f32.mrf.mxu1 }
  0xe0   : > { %v4036_v21 = vpop.f32.mrf.mxu0  ;;  %v1401_v11 = vsel %vm1357_vm6, %v1391_v31, %v1400_v6  ;;  %v1585_v31 = vld [vmem:[%s4875_s1 + $0x20] sm:$0xff] }
  0xe1   : > { %1616 = vperm.xlu2 %3664, %v1585_v31  }
  0xe2   : > { %3400 = vmatmul.msk.bf16.vlgmr.msra.gmra.mxu3 %vm370_vm1, %v1260_v27 }
  0xe3   : > { %v4022_v38 = vpop.f32.mrf.mxu2  ;;  %3411 = vmatmul.msk.bf16.gmra.mxu0 %vm370_vm1, %v1401_v11 }
  0xe5   : > { %v435_v44 = vpop.f32.mrf.mxu3 }
  0xe6   : > { %v536_v45 = vadd.f32 %v535_v30, %v435_v44  ;;  %v663_v44 = vadd.f32 %v3967_v29, %v508_v9  ;;  %v1586_v29 = vld [vmem:[%s4875_s1 + $0x28] sm:$0xff] }
  0xe7   : > { %v537_v48 = vpop.f32.mrf.mxu1 }
  0xe8   : > { %v4048_v27 = vpop.f32.mrf.mxu0 }
  0xe9   : > { %1621 = vperm.xlu2 %3664, %v1586_v29  }
  0xeb   : > { %v658_v52 = vpop.f32.mrf.mxu2 }
  0xec   : > { %v4033_v58 = vadd.f32 %v658_v52, %v536_v45 }
  0xed   : > { %v437_v59 = vpop.f32.mrf.mxu3 }
  0xef   : > { %v1021_v22 = vpop.f32.mrf.mxu1 }
  0xf0   : > { %v4062_v59 = vpop.f32.mrf.mxu0 }
  0xf2   : > { %3401 = vmatmul.msk.bf16.gmra.mxu3 %vm370_vm1, %v1262_v3  ;;  %v1351_v3 = vld [vmem:[%s3752_s18 + $0x34] sm:$0xf] }
  0xf3   : > { %v660_v13 = vpop.f32.mrf.mxu2 }
  0xf4   : > { %v1355_v13 = vunpack.c.l.b16 %v1351_v3 }
  0xf5   : > { %v757_v16 = vpop.f32.mrf.mxu3 }
  0xf6   : > { %v791_v0 = vadd.f32 %v757_v16, %v3918_v37  ;;  %v1406_v37 = vshll.u32 %v3913_v28, 16  ;;  %v1356_v9 = vpack.c.b16 %v1355_v13, %v1355_v13 }
  0xf7   : > { %v4042_v20 = vpop.f32.mrf.mxu1 }
  0xf8   : > { %v920_v12 = vadd.f32 %v3980_v53, %v791_v0  ;;  %v1408_v53 = vrot.slane %v1406_v37, 2  ;;  %v4082_v0 = vpop.f32.mrf.mxu0  ;;  %v1412_v34 = vshrl.u32 %v1356_v9, 16 }
  0xfa   : > { %v1055_v30 = vadd.f32 %v1021_v22, %v920_v12  ;;  %v1409_v55 = vor.u32 %v1408_v53, %v1405_v17 }
  0xfb   : > { %v1163_v45 = vpop.f32.mrf.mxu2 }
  0xfc   : > { %v4056_v48 = vadd.f32 %v1163_v45, %v1055_v30  ;;  %v1410_v28 = vsel %vm1357_vm6, %v1400_v6, %v1409_v55  ;;  %v3617_v6 = vld [vmem:[%s3752_s18 + $0x5c] sm:$0xff] }
  0xfd   : > { %v759_v57 = vpop.f32.mrf.mxu3  ;;  %3412 = vmatmul.msk.bf16.gmra.mxu0 %vm370_vm1, %v1410_v28  ;;  %v1589_v30 = vld [vmem:[%s4875_s1 + $0x40] sm:$0xff]  ;;  %v1265_v31 = vrot.slane %v3617_v6, 1 }
  0xfe   : > { %v792_v49 = vadd.f32 %v759_v57, %v663_v44  ;;  %1636 = vperm.xlu2 %3664, %v1589_v30   ;;  %v1414_v57 = vrot.slane %v1412_v34, 1 }
  0xff   : > { %v1026_v33 = vpop.f32.mrf.mxu1 }
 0x100   : > { %v4060_v52 = vadd.f32 %v3999_v5, %v792_v49  ;;  %v3422_v5 = vld [vmem:[%s4878_s4 + $0x4] sm:$0xf]  ;;  %v1266_v49 = vsel %vm1116_vm3, %v1263_v43, %v1265_v31  ;;  %v906_v29 = vpop.f32.mrf.mxu0 }
 0x101   : > { %v1997_v11 = vsel %vm1995_vm7, %v3422_v5, 0  ;;  %v3618_v5 = vld [vmem:[%s3752_s18 + $0x64] sm:$0xff] }
 0x102   : > { %3402 = vmatmul.msk.bf16.gmra.mxu3 %vm370_vm1, %v1264_v39  ;;  %2006 = vmatpush.bf16.msra.mxu2 %v1997_v11  ;;  %v1267_v11 = vrot.slane %v3618_v5, 1 }
 0x103   : > { %v4069_v63 = vpop.f32.mrf.mxu2 }
 0x105   : > { %v762_v51 = vpop.f32.mrf.mxu3 }
 0x106   : > { %v793_v1 = vadd.f32 %v762_v51, %v3880_v61  ;;  %v1500_v61 = vld [vmem:[%s4880_s6] sm:$0x3] }
 0x107   : > { %v4077_v22 = vpop.f32.mrf.mxu1  ;;  %v1506_v23 = vsel %vm392_vm0, %v1500_v61, 0  ;;  %vm1973_vm0 = vcmask 64512  }
 0x108   : > { %v922_v16 = vadd.f32 %v4015_v32, %v793_v1  ;;  %1515 = vmatpush.bf16.msra.mxu1 %v1506_v23  ;;  %v1415_v32 = vshll.u32 %v1356_v9, 16  ;;  %v4113_v6 = vpop.f32.mrf.mxu0  ;;  %v1268_v23 = vsel %vm1116_vm3, %v1265_v31, %v1267_v11  ;;  %v3374_v9 = vld [vmem:[%s3752_s18 + $0x6c] sm:$0x7] }
 0x10a   : > { %v1057_v12 = vadd.f32 %v1026_v33, %v922_v16  ;;  %v1417_v17 = vrot.slane %v1415_v32, 2 }
 0x10b   : > { %v1168_v37 = vpop.f32.mrf.mxu2  ;;  %3415 = vmatmul.msk.bf16.vlgmr.msra.gmra.mxu1 %vm370_vm1, %v3792_v54  ;;  %v1592_v54 = vld [vmem:[%s4875_s1 + $0x58] sm:$0xff] }
 0x10c   : > { %v4091_v44 = vadd.f32 %v1168_v37, %v1057_v12  ;;  %v1418_v33 = vor.u32 %v1417_v17, %v1414_v57  ;;  %1651 = vperm.xlu2 %3664, %v1592_v54  }
 0x10d   : > { %v764_v45 = vpop.f32.mrf.mxu3 }
 0x10e   : > { %v794_v53 = vadd.f32 %v764_v45, %v3897_v10  ;;  %v1419_v51 = vsel %vm1357_vm6, %v1409_v55, %v1418_v33 }
 0x10f   : > { %v1031_v39 = vpop.f32.mrf.mxu1  ;;  %3413 = vmatmul.msk.bf16.gmra.mxu0 %vm370_vm1, %v1419_v51 }
 0x110   : > { %v4098_v28 = vadd.f32 %v4026_v50, %v794_v53  ;;  %v911_v12 = vpop.f32.mrf.mxu0 }
 0x112   : > { %3403 = vmatmul.msk.bf16.gmra.mxu3 %vm370_vm1, %v1266_v49 }
 0x113   : > { %v4105_v1 = vpop.f32.mrf.mxu2 }
 0x115   : > { %v767_v10 = vpop.f32.mrf.mxu3 }
 0x116   : > { %v795_v43 = vadd.f32 %v767_v10, %v3907_v25 }
 0x117   : > { %v4109_v50 = vpop.f32.mrf.mxu1 }
 0x118   : > { %v924_v3 = vadd.f32 %v4036_v21, %v795_v43  ;;  %v1250_v21 = vunpack.c.l.b16 %v3374_v9  ;;  %v4131_v57 = vpop.f32.mrf.mxu0 }
 0x11a   : > { %v1059_v55 = vadd.f32 %v1031_v39, %v924_v3  ;;  %v1257_v45 = vpack.c.b16 %v1250_v21, %v1250_v21 }
 0x11b   : > { %v1173_v13 = vpop.f32.mrf.mxu2  ;;  %3416 = vmatmul.msk.bf16.gmra.mxu1 %vm370_vm1, %v3819_v8 }
 0x11c   : > { %v4115_v16 = vadd.f32 %v1173_v13, %v1059_v55  ;;  %v1269_v17 = vrot.slane %v1257_v45, 1 }
 0x11d   : > { %v4117_v61 = vpop.f32.mrf.mxu3 }
 0x11f   : > { %v1036_v25 = vpop.f32.mrf.mxu1  ;;  %3414 = vmatmul.msk.bf16.gmra.mxu0 %vm370_vm1, %v1418_v33  ;;  %v1270_v33 = vsel %vm1116_vm3, %v1267_v11, %v1269_v17 }
 0x120   : > { %v916_v51 = vpop.f32.mrf.mxu0 }
 0x122   : > { %3404 = vmatmul.msk.bf16.gmra.mxu3 %vm370_vm1, %v1268_v23 }
 0x123   : > { %v4124_v30 = vpop.f32.mrf.mxu2 }
 0x125   : > { %v772_v34 = vpop.f32.mrf.mxu3 }
 0x126   : > { %v797_v32 = vadd.f32 %v772_v34, %v3940_v60 }
 0x127   : > { %v4128_v37 = vpop.f32.mrf.mxu1 }
 0x128   : > { %v926_v8 = vadd.f32 %v4062_v59, %v797_v32  ;;  %v918_v3 = vpop.f32.mrf.mxu0 }
 0x12a   : > { %v1061_v31 = vadd.f32 %v1036_v25, %v926_v8 }
 0x12b   : > { %v1178_v53 = vpop.f32.mrf.mxu2  ;;  %3417 = vmatmul.msk.bf16.gmra.mxu1 %vm370_vm1, %v3837_v24 }
 0x12c   : > { %v4133_v49 = vadd.f32 %v1178_v53, %v1061_v31 }
 0x12d   : > { %v4135_v39 = vpop.f32.mrf.mxu3 }
 0x12f   : > { %v1041_v60 = vpop.f32.mrf.mxu1 }
 0x130   : > { %v1453_v25 = vpop.f32.mrf.mxu0 }
 0x132   : > { %3405 = vmatmul.msk.bf16.gmra.mxu3 %vm370_vm1, %v1270_v33 }
 0x133   : > { %v4141_v54 = vpop.f32.mrf.mxu2 }
 0x135   : > { %v777_v59 = vpop.f32.mrf.mxu3 }
 0x136   : > { %v799_v10 = vadd.f32 %v777_v59, %v3973_v41 }
 0x137   : > { %v4144_v43 = vpop.f32.mrf.mxu1 }
 0x138   : > { %v928_v5 = vadd.f32 %v906_v29, %v799_v10  ;;  %v1455_v45 = vpop.f32.mrf.mxu0 }
 0x13a   : > { %v1063_v55 = vadd.f32 %v1041_v60, %v928_v5 }
 0x13b   : > { %v1183_v13 = vpop.f32.mrf.mxu2  ;;  %3418 = vmatmul.msk.bf16.gmra.mxu1 %vm370_vm1, %v3853_v35  ;;  %v1677_v35 = vld [vmem:[#allocation2 + $0x4] sm:$0x3] }
 0x13c   : > { %v4146_v23 = vadd.f32 %v1183_v13, %v1063_v55 }
 0x13d   : > { %v4148_v24 = vpop.f32.mrf.mxu3 }
 0x13f   : > { %v1046_v11 = vpop.f32.mrf.mxu1 }
 0x140   : > { %v1458_v33 = vpop.f32.mrf.mxu0 }
 0x142   : > { %3406 = vmatmul.msk.bf16.gmra.mxu3 %vm370_vm1, %v1269_v17 }
 0x143   : > { %v4153_v9 = vpop.f32.mrf.mxu2 }
 0x145   : > { %v782_v41 = vpop.f32.mrf.mxu3 }
 0x146   : > { %v801_v21 = vadd.f32 %v782_v41, %v4007_v18  ;;  %v1678_v18 = vsel %vm1676_vm10, 0, %v1677_v35  ;;  %v1056_v35 = vadd.f32 %v4042_v20, %v4060_v52  ;;  %v3457_v20 = vld [vmem:[%s4878_s4 + $0x8] sm:$0xf]  ;;  %vm1682_vm10 = vmand %vm1680_vm8, %vm1681_vm9 }
 0x147   : > { %v4156_v29 = vpop.f32.mrf.mxu1  ;;  %1679 = vst [vmem:[#allocation2 + $0x4] sm:$0x3] %v1678_v18  ;;  %v2147_v52 = vsel %vm1995_vm7, %v3457_v20, 0 }
 0x148   : > { %v930_v34 = vadd.f32 %v911_v12, %v801_v21  ;;  %v4168_v55 = vpop.f32.mrf.mxu0  ;;  %2156 = vmatpush.bf16.msrb.mxu0 %v2147_v52 }
 0x14a   : > { %v1065_v32 = vadd.f32 %v1046_v11, %v930_v34 }
 0x14b   : > { %v1188_v8 = vpop.f32.mrf.mxu2  ;;  %3419 = vmatmul.msk.bf16.gmra.mxu1 %vm370_vm1, %v3868_v47  ;;  %v1881_v47 = vld [vmem:[%s4878_s4] sm:$0xf] }
 0x14c   : > { %v4158_v31 = vadd.f32 %v1188_v8, %v1065_v32  ;;  %v2061_v21 = vsel %vm1995_vm7, %v1881_v47, 0  ;;  %v4184_v8 = vld [vmem:[%s4877_s3] ss:$0 sm:$0xff] }
 0x14d   : > { %v4160_v53 = vpop.f32.mrf.mxu3  ;;  %2070 = vmatpush.bf16.msrb.mxu3 %v2061_v21 }
 0x14f   : > { %v1051_v17 = vpop.f32.mrf.mxu1 }
 0x153   : > { %v4165_v12 = vpop.f32.mrf.mxu2 }
 0x155   : > { %v787_v60 = vpop.f32.mrf.mxu3 }
 0x156   : > { %v803_v59 = vadd.f32 %v787_v60, %v4033_v58  ;;  %v4178_v58 = vpop.f32.mrf.mxu0  ;;  %v1597_v60 = vpop.permute.xlu0 %1596 }
 0x157   : > { %v1053_v10 = vpop.f32.mrf.mxu1 }
 0x158   : > { %v932_v5 = vadd.f32 %v916_v51, %v803_v59  ;;  %v1198_v59 = vadd.f32 %v4069_v63, %v1056_v35 }
 0x15a   : > { %v1067_v3 = vadd.f32 %v1051_v17, %v932_v5 }
 0x15b   : > { %v1193_v13 = vpop.f32.mrf.mxu2  ;;  %3420 = vmatmul.msk.bf16.gmra.mxu1 %vm370_vm1, %v3887_v4 }
 0x15c   : > { %v4173_v11 = vadd.f32 %v1193_v13, %v1067_v3 }
 0x15d   : > { %v789_v41 = vpop.f32.mrf.mxu3 }
 0x15e   : > { %v4189_v18 = vpop.f32.mrf.mxu0 }
 0x163   : > { %v1195_v51 = vpop.f32.mrf.mxu2 }
 0x165   : > { %v1304_v34 = vpop.f32.mrf.mxu3 }
 0x166   : > { %v1338_v32 = vadd.f32 %v1304_v34, %v4056_v48  ;;  %v4199_v21 = vpop.f32.mrf.mxu0 }
 0x168   : > { %v1487_v17 = vadd.f32 %v1453_v25, %v1338_v32  ;;  %v1602_v32 = vpop.permute.xlu0 %1601 }
 0x16a   : > { %v1555_v4 = vadd.f32 %v4184_v8, %v1487_v17 }
 0x16b   : > { %3421 = vmatmul.msk.bf16.gmra.mxu1 %vm370_vm1, %v3916_v36  ;;  %vm2500_vm1 = vcmask 1045504  }
 0x16c   : > { %v1568_v10 = vmax.f32 %v1555_v4, 0.0 }
 0x16d   : > { %v1306_v5 = vpop.f32.mrf.mxu3 }
 0x16e   : > { %v1659_v48 = vmul.f32 %v1597_v60, %v1568_v10  ;;  %v1339_v3 = vadd.f32 %v1306_v5, %v1198_v59  ;;  %v1058_v59 = vadd.f32 %v4077_v22, %v4098_v28  ;;  %v4208_v52 = vpop.f32.mrf.mxu0  ;;  %v518_v22 = vadd.f32 %v3900_v14, %v3909_v26  ;;  %v1607_v28 = vpop.permute.xlu1 %1606 }
 0x170   : > { %v1689_v13 = vpack.c.bf16 %v1659_v48, %v1659_v48  ;;  %v1488_v47 = vadd.f32 %v1455_v45, %v1339_v3  ;;  %v1848_v45 = vld [vmem:[#allocation2 + $0x4] sm:$0xe]  ;;  %v3465_v3 = vld [vmem:[%s4878_s4 + $0xc] sm:$0xf] }
 0x172   : > { %v1705_v25 = vshrl.u32 %v1689_v13, 16  ;;  %v1708_v41 = vshll.u32 %v1689_v13, 16  ;;  %v1556_v63 = vadd.f32 %v4184_v8, %v1488_v47 }
 0x174   : > { %v1707_v36 = vrot.slane %v1705_v25, 6  ;;  %v1710_v51 = vrot.slane %v1708_v41, 7  ;;  %v1569_v34 = vmax.f32 %v1556_v63, 0.0 }
 0x175   : > { %v1309_v35 = vpop.f32.mrf.mxu3 }
 0x176   : > { %v1711_v17 = vor.u32 %v1710_v51, %v1707_v36  ;;  %v1660_v4 = vmul.f32 %v1602_v32, %v1569_v34  ;;  %v1340_v60 = vadd.f32 %v1309_v35, %v4091_v44  ;;  %v2288_v44 = vsel %vm1995_vm7, %v3465_v3, 0 }
 0x177   : > { %2297 = vmatpush.bf16.msrb.mxu1 %v2288_v44  ;;  %v667_v36 = vadd.f32 %v3927_v40, %v518_v22 }
 0x178   : > { %v1849_v10 = vsel %vm1847_vm13, %v1711_v17, %v1848_v45  ;;  %v1690_v5 = vpack.c.bf16 %v1660_v4, %v1660_v4  ;;  %v1489_v48 = vadd.f32 %v1458_v33, %v1340_v60  ;;  %v1200_v33 = vadd.f32 %v4105_v1, %v1058_v59 }
 0x179   : > { %1850 = vst [vmem:[#allocation2 + $0x4] sm:$0xe] %v1849_v10  ;;  %v1712_v32 = vrot.slane %v1711_v17, 4  ;;  %v796_v35 = vadd.f32 %v4117_v61, %v667_v36  ;;  %v3646_v36 = vld [vmem:[#allocation2] sm:$0xe] }
 0x17a   : > { %v1714_v13 = vshrl.u32 %v1690_v5, 16  ;;  %v1717_v47 = vshll.u32 %v1690_v5, 16  ;;  %v1557_v20 = vadd.f32 %v4184_v8, %v1489_v48  ;;  %v4231_v5 = vpop.f32.mrf.mxu0 }
 0x17b   : > { %v925_v61 = vadd.f32 %v4048_v27, %v796_v35 }
 0x17c   : > { %v1716_v25 = vrot.slane %v1714_v13, 6  ;;  %v1719_v41 = vrot.slane %v1717_v47, 7  ;;  %v1570_v63 = vmax.f32 %v1557_v20, 0.0  ;;  %v1612_v47 = vpop.permute.xlu1 %1611 }
 0x17d   : > { %v1311_v34 = vpop.f32.mrf.mxu3 }
 0x17e   : > { %v1720_v45 = vor.u32 %v1719_v41, %v1716_v25  ;;  %v1661_v14 = vmul.f32 %v1607_v28, %v1570_v63  ;;  %v1341_v26 = vadd.f32 %v1311_v34, %v1200_v33  ;;  %v523_v33 = vadd.f32 %v3931_v46, %v3942_v62 }
 0x17f   : > { %v1060_v25 = vadd.f32 %v4109_v50, %v925_v61 }
 0x180   : > { %v1721_v1 = vsel %vm4217_vm15, %v1712_v32, %v1720_v45  ;;  %v1691_v4 = vpack.c.bf16 %v1661_v14, %v1661_v14  ;;  %v1490_v40 = vadd.f32 %v4168_v55, %v1341_v26  ;;  %v4225_v60 = vld [vmem:[#allocation2] sm:$0xff]   ;;  %v1722_v20 = vrot.slane %v1720_v45, 4 }
 0x181   : > { %1851 = vst.msk [vmem:[#allocation2 + $0x8] sm:$0xf] %vm1672_vm4, %v1721_v1  ;;  %3450 = vmatmul.msk.bf16.vlgmr.msrb.gmra.mxu3 %vm1973_vm0, %v4225_v60  ;;  %v669_v34 = vadd.f32 %v3956_v15, %v523_v33  ;;  %v3645_v32 = vld [vmem:[#allocation2] sm:$0xf0]  ;;  %v1202_v15 = vadd.f32 %v4124_v30, %v1060_v25 }
 0x182   : > { %v1724_v59 = vshrl.u32 %v1691_v4, 16  ;;  %v1727_v17 = vshll.u32 %v1691_v4, 16  ;;  %v1558_v10 = vadd.f32 %v4184_v8, %v1490_v40 }
 0x183   : > { %v798_v26 = vadd.f32 %v4135_v39, %v669_v34 }
 0x184   : > { %v1726_v48 = vrot.slane %v1724_v59, 6  ;;  %v1729_v3 = vrot.slane %v1727_v17, 7  ;;  %v1571_v13 = vmax.f32 %v1558_v10, 0.0  ;;  %v2205_v59 = vld [vmem:[#allocation2 + $0x4] sm:$0xe]  ;;  %v4252_v17 = vpop.f32.mrf.mxu0  ;;  %v1921_v10 = vshll.u32 %v4225_v60, 16 }
 0x185   : > { %v1314_v55 = vpop.f32.mrf.mxu3 }
 0x186   : > { %v1730_v44 = vor.u32 %v1729_v3, %v1726_v48  ;;  %v1662_v22 = vmul.f32 %v1612_v47, %v1571_v13  ;;  %v1342_v28 = vadd.f32 %v1314_v55, %v4115_v16  ;;  %v3493_v16 = vld [vmem:[%s4878_s4 + $0x10] sm:$0xf]  ;;  %v3647_v48 = vor.u32 %v3646_v36, %v3645_v32 }
 0x187   : > { %v2436_v50 = vsel %vm1995_vm7, %v3493_v16, 0 }
 0x188   : > { %v1731_v41 = vsel %vm4217_vm15, %v1722_v20, %v1730_v44  ;;  %v1692_v63 = vpack.c.bf16 %v1662_v22, %v1662_v22  ;;  %v1491_v27 = vadd.f32 %v4178_v58, %v1342_v28  ;;  %v2206_v14 = vld [vmem:[#allocation2 + $0x8] sm:$0xf]  ;;  %v1617_v58 = vpop.permute.xlu2 %1616  ;;  %2445 = vmatpush.bf16.msrb.mxu2 %v2436_v50  ;;  %v4249_v35 = vpop.f32.mrf.mxu1  ;;  %v1732_v13 = vrot.slane %v1730_v44, 4 }
 0x189   : > { %1852 = vst.msk [vmem:[#allocation2 + $0xc] sm:$0xf] %vm1672_vm4, %v1731_v41  ;;  %v2234_v3 = vunpack.c.l.b16 %v2206_v14  ;;  %v927_v20 = vadd.f32 %v4082_v0, %v798_v26  ;;  %v2233_v22 = vunpack.c.l.b16 %v2205_v59  ;;  %v2494_v41 = vld [vmem:[#allocation2 + $0x4] sm:$0xc] }
 0x18a   : > { %v1734_v45 = vshrl.u32 %v1692_v63, 16  ;;  %v1737_v46 = vshll.u32 %v1692_v63, 16  ;;  %v1559_v62 = vadd.f32 %v4184_v8, %v1491_v27  ;;  %v1923_v63 = vrot.slane %v1921_v10, 1 }
 0x18b   : > { %v2112_v27 = vrot.slane %v3647_v48, 1  ;;  %v2246_v44 = vpack.c.b16 %v2234_v3, %v2233_v22  ;;  %v1062_v16 = vadd.f32 %v4128_v37, %v927_v20 }
 0x18c   : > { %v1736_v1 = vrot.slane %v1734_v45, 6  ;;  %v1739_v4 = vrot.slane %v1737_v46, 7  ;;  %v1572_v40 = vmax.f32 %v1559_v62, 0.0  ;;  %v2498_v62 = vunpack.c.l.b16 %v2494_v41 }
 0x18d   : > { %v1316_v61 = vpop.f32.mrf.mxu3  ;;  %v2356_v20 = vshll.u32 %v2246_v44, 16  ;;  %v1204_v22 = vadd.f32 %v4141_v54, %v1062_v16 }
 0x18e   : > { %v1740_v47 = vor.u32 %v1739_v4, %v1736_v1  ;;  %v1663_v39 = vmul.f32 %v1617_v58, %v1572_v40  ;;  %v1343_v55 = vadd.f32 %v1316_v61, %v1202_v15  ;;  %v2353_v40 = vshrl.u32 %v2246_v44, 16 }
 0x190   : > { %v1741_v30 = vsel %vm4217_vm15, %v1732_v13, %v1740_v47  ;;  %v1693_v28 = vpack.c.bf16 %v1663_v39, %v1663_v39  ;;  %v1492_v33 = vadd.f32 %v4189_v18, %v1343_v55  ;;  %v4259_v25 = vld [vmem:[#allocation2 + $0x8] sm:$0xff]  ;;  %v1919_v18 = vshrl.u32 %v4225_v60, 16  ;;  %v4269_v46 = vpop.f32.mrf.mxu1  ;;  %v1622_v15 = vpop.permute.xlu2 %1621 }
 0x191   : > { %1853 = vst.msk [vmem:[#allocation2 + $0x10] sm:$0xf] %vm1672_vm4, %v1741_v30  ;;  %3451 = vmatmul.msk.bf16.gmra.mxu3 %vm1973_vm0, %v4259_v25  ;;  %v2113_v0 = vrot.slane %v4259_v25, 1  ;;  %v1926_v45 = vshll.u32 %v4259_v25, 16  ;;  %v2499_v60 = vpack.c.b16 %v2234_v3, %v2498_v62  ;;  %v1742_v59 = vrot.slane %v1740_v47, 4  ;;  %v4278_v13 = vpop.f32.mrf.mxu0 }
 0x192   : > { %v1744_v36 = vshrl.u32 %v1693_v28, 16  ;;  %v1747_v34 = vshll.u32 %v1693_v28, 16  ;;  %v1560_v32 = vadd.f32 %v4184_v8, %v1492_v33  ;;  %v1924_v1 = vor.u32 %v1923_v63, %v1919_v18  ;;  %v4302_v62 = vld [vmem:[#allocation2 + $0xc] sm:$0xf] }
 0x193   : > { %v2114_v58 = vsel %vm1116_vm3, %v2112_v27, %v2113_v0  ;;  %v4275_v37 = vrot.slane %v1926_v45, 1  ;;  %v528_v39 = vadd.f32 %v3964_v7, %v3975_v42  ;;  %v2253_v28 = vrot.slane %v2246_v44, 1 }
 0x194   : > { %v1746_v50 = vrot.slane %v1744_v36, 6  ;;  %v1749_v14 = vrot.slane %v1747_v34, 7  ;;  %v1573_v26 = vmax.f32 %v1560_v32, 0.0  ;;  %3458 = vmatmul.msk.bf16.vlgmr.msrb.gmra.mxu0 %vm1973_vm0, %v2114_v58  ;;  %v2501_v7 = vrot.slane %v2499_v60, 2 }
 0x195   : > { %v1319_v4 = vpop.f32.mrf.mxu3  ;;  %v1929_v55 = vsel %vm545_vm2, %v1924_v1, %v4275_v37  ;;  %v2355_v42 = vrot.slane %v2353_v40, 1  ;;  %v2358_v36 = vrot.slane %v2356_v20, 2 }
 0x196   : > { %v1750_v10 = vor.u32 %v1749_v14, %v1746_v50  ;;  %v1664_v61 = vmul.f32 %v1622_v15, %v1573_v26  ;;  %v1344_v48 = vadd.f32 %v1319_v4, %v4133_v49  ;;  %3443 = vmatmul.msk.bf16.vlgmr.msra.gmra.mxu2 %vm1973_vm0, %v1929_v55  ;;  %v671_v50 = vadd.f32 %v3988_v56, %v528_v39  ;;  %v1627_v14 = vpop.permute.xlu0 %1626 }
 0x197   : > { %v2359_v55 = vor.u32 %v2358_v36, %v2355_v42  ;;  %v2766_v39 = vunpack.c.l.b16 %v4302_v62 }
 0x198   : > { %v1751_v3 = vsel %vm4217_vm15, %v1742_v59, %v1750_v10  ;;  %v1694_v30 = vpack.c.bf16 %v1664_v61, %v1664_v61  ;;  %v1493_v47 = vadd.f32 %v4199_v21, %v1344_v48  ;;  %v4289_v49 = vld [vmem:[#allocation2 + $0xc] sm:$0xff]  ;;  %v4294_v27 = vpop.f32.mrf.mxu1  ;;  %v1752_v4 = vrot.slane %v1750_v10, 4  ;;  %v2929_v61 = vld [vmem:[#allocation2 + $0x8] sm:$0x8] }
 0x199   : > { %1854 = vst.msk [vmem:[#allocation2 + $0x14] sm:$0xf] %vm1672_vm4, %v1751_v3  ;;  %v2254_v63 = vrot.slane %v4289_v49, 1  ;;  %v2502_v21 = vrot.slane %v4289_v49, 2  ;;  %v2361_v34 = vshrl.u32 %v4289_v49, 16  ;;  %v2364_v32 = vshll.u32 %v4289_v49, 16  ;;  %v4320_v10 = vpop.f32.mrf.mxu0 }
 0x19a   : > { %v1754_v33 = vshrl.u32 %v1694_v30, 16  ;;  %v1757_v41 = vshll.u32 %v1694_v30, 16  ;;  %v1561_v54 = vadd.f32 %v4184_v8, %v1493_v47  ;;  %v800_v48 = vadd.f32 %v4148_v24, %v671_v50  ;;  %v1632_v50 = vpop.permute.xlu1 %1631 }
 0x19b   : > { %v2255_v45 = vsel %vm1116_vm3, %v2253_v28, %v2254_v63  ;;  %v4309_v58 = vsel %vm2500_vm1, %v2501_v7, %v2502_v21  ;;  %v2363_v15 = vrot.slane %v2361_v34, 1  ;;  %v2366_v1 = vrot.slane %v2364_v32, 2 }
 0x19c   : > { %v1756_v16 = vrot.slane %v1754_v33, 6  ;;  %v1759_v44 = vrot.slane %v1757_v41, 7  ;;  %v1574_v18 = vmax.f32 %v1561_v54, 0.0  ;;  %3486 = vmatmul.msk.bf16.vlgmr.msrb.gmra.mxu1 %vm1973_vm0, %v2255_v45  ;;  %v929_v41 = vadd.f32 %v4113_v6, %v800_v48 }
 0x19d   : > { %v1321_v26 = vpop.f32.mrf.mxu3  ;;  %v4312_v56 = vor.u32 %v2366_v1, %v2363_v15  ;;  %v1930_v54 = vshrl.u32 %v4259_v25, 16 }
 0x19e   : > { %v1760_v60 = vor.u32 %v1759_v44, %v1756_v16  ;;  %v1665_v40 = vmul.f32 %v1627_v14, %v1574_v18  ;;  %v1345_v59 = vadd.f32 %v1321_v26, %v1204_v22  ;;  %v2933_v22 = vunpack.c.l.b16 %v2929_v61 }
 0x19f   : > { %v4325_v24 = vsel %vm1357_vm6, %v2359_v55, %v4312_v56  ;;  %v1932_v26 = vor.u32 %v1930_v54, %v4275_v37  ;;  %v1064_v25 = vadd.f32 %v4144_v43, %v929_v41 }
 0x1a0   : > { %v1761_v20 = vsel %vm4217_vm15, %v1752_v4, %v1760_v60  ;;  %v1695_v3 = vpack.c.bf16 %v1665_v40, %v1665_v40  ;;  %v1494_v30 = vadd.f32 %v4208_v52, %v1345_v59  ;;  %v4318_v47 = vld [vmem:[#allocation2 + $0x10] sm:$0xff]  ;;  %v4336_v34 = vpop.f32.mrf.mxu1  ;;  %v2934_v32 = vpack.c.b16 %v2766_v39, %v2933_v22 }
 0x1a1   : > { %1855 = vst.msk [vmem:[#allocation2 + $0x18] sm:$0xf] %vm1672_vm4, %v1761_v20  ;;  %3452 = vmatmul.msk.bf16.gmra.mxu3 %vm1973_vm0, %v4318_v47  ;;  %v2115_v52 = vrot.slane %v4318_v47, 1  ;;  %v4331_v33 = vld [vmem:[#allocation2 + $0x10] sm:$0xff]  ;;  %v1934_v36 = vshll.u32 %v4318_v47, 16  ;;  %v1762_v6 = vrot.slane %v1760_v60, 4  ;;  %v4360_v20 = vpop.f32.mrf.mxu0 }
 0x1a2   : > { %v1764_v28 = vshrl.u32 %v1695_v3, 16  ;;  %v1767_v7 = vshll.u32 %v1695_v3, 16  ;;  %v1562_v42 = vadd.f32 %v4184_v8, %v1494_v30  ;;  %v2937_v59 = vrot.slane %v4331_v33, 3 }
 0x1a3   : > { %v2116_v45 = vsel %vm1116_vm3, %v2113_v0, %v2115_v52  ;;  %v4347_v15 = vrot.slane %v1934_v36, 1  ;;  %v2936_v60 = vrot.slane %v2934_v32, 3 }
 0x1a4   : > { %v1766_v16 = vrot.slane %v1764_v28, 6  ;;  %v1769_v44 = vrot.slane %v1767_v7, 7  ;;  %v1575_v18 = vmax.f32 %v1562_v42, 0.0  ;;  %3459 = vmatmul.msk.bf16.gmra.mxu0 %vm1973_vm0, %v2116_v45  ;;  %v1206_v28 = vadd.f32 %v4153_v9, %v1064_v25  ;;  %v1637_v9 = vpop.permute.xlu2 %1636 }
 0x1a5   : > { %v1324_v14 = vpop.f32.mrf.mxu3  ;;  %v1937_v0 = vsel %vm545_vm2, %v1932_v26, %v4347_v15  ;;  %v4368_v43 = vsel %vm2935_vm5, %v2936_v60, %v2937_v59 }
 0x1a6   : > { %v1770_v1 = vor.u32 %v1769_v44, %v1766_v16  ;;  %v1666_v4 = vmul.f32 %v1632_v50, %v1575_v18  ;;  %v1346_v40 = vadd.f32 %v1324_v14, %v4146_v23  ;;  %3444 = vmatmul.msk.bf16.gmra.mxu2 %vm1973_vm0, %v1937_v0  ;;  %v533_v23 = vadd.f32 %v3996_v2, %v4009_v19  ;;  %v1683_v0 = vld [vmem:[#allocation2 + $0x34] sm:$0x8] }
 0x1a7   : > { %v1684_v60 = vsel %vm1682_vm10, 0, %v1683_v0 }
 0x1a8   : > { %v1771_v61 = vsel %vm4217_vm15, %v1762_v6, %v1770_v1  ;;  %v1696_v48 = vpack.c.bf16 %v1666_v4, %v1666_v4  ;;  %v1495_v37 = vadd.f32 %v4231_v5, %v1346_v40  ;;  %v4358_v55 = vld [vmem:[#allocation2 + $0x14] sm:$0xff]  ;;  %v4373_v7 = vpop.f32.mrf.mxu1  ;;  %v673_v16 = vadd.f32 %v4022_v38, %v533_v23  ;;  %1685 = vst [vmem:[#allocation2 + $0x34] sm:$0x8] %v1684_v60 }
 0x1a9   : > { %1856 = vst.msk [vmem:[#allocation2 + $0x1c] sm:$0xf] %vm1672_vm4, %v1771_v61  ;;  %v2256_v22 = vrot.slane %v4358_v55, 1  ;;  %v2504_v42 = vrot.slane %v4358_v55, 2  ;;  %v2370_v2 = vshrl.u32 %v4358_v55, 16  ;;  %v2373_v19 = vshll.u32 %v4358_v55, 16 }
 0x1aa   : > { %v1774_v3 = vshrl.u32 %v1696_v48, 16  ;;  %v1777_v30 = vshll.u32 %v1696_v48, 16  ;;  %v1563_v5 = vadd.f32 %v4184_v8, %v1495_v37  ;;  %v1772_v6 = vrot.slane %v1770_v1, 4  ;;  %v1485_v1 = vpop.f32.mrf.mxu0 }
 0x1ab   : > { %v2257_v32 = vsel %vm1116_vm3, %v2254_v63, %v2256_v22  ;;  %v4390_v18 = vsel %vm2500_vm1, %v2502_v21, %v2504_v42  ;;  %v2372_v45 = vrot.slane %v2370_v2, 1  ;;  %v2375_v50 = vrot.slane %v2373_v19, 2 }
 0x1ac   : > { %v1776_v41 = vrot.slane %v1774_v3, 6  ;;  %v1779_v54 = vrot.slane %v1777_v30, 7  ;;  %v1576_v36 = vmax.f32 %v1563_v5, 0.0  ;;  %3487 = vmatmul.msk.bf16.gmra.mxu1 %vm1973_vm0, %v2257_v32  ;;  %v802_v63 = vadd.f32 %v4160_v53, %v673_v16 }
 0x1ad   : > { %v1326_v44 = vpop.f32.mrf.mxu3  ;;  %v4393_v38 = vor.u32 %v2375_v50, %v2372_v45  ;;  %v1938_v30 = vshrl.u32 %v4318_v47, 16 }
 0x1ae   : > { %v1780_v14 = vor.u32 %v1779_v54, %v1776_v41  ;;  %v1667_v26 = vmul.f32 %v1637_v9, %v1576_v36  ;;  %v1347_v4 = vadd.f32 %v1326_v44, %v1206_v28  ;;  %v931_v3 = vadd.f32 %v4131_v57, %v802_v63  ;;  %v1642_v54 = vpop.permute.xlu0 %1641 }
 0x1af   : > { %v4404_v53 = vsel %vm1357_vm6, %v4312_v56, %v4393_v38  ;;  %v1940_v57 = vor.u32 %v1938_v30, %v4347_v15 }
 0x1b0   : > { %v1781_v40 = vsel %vm4217_vm15, %v1772_v6, %v1780_v14  ;;  %v1697_v25 = vpack.c.bf16 %v1667_v26, %v1667_v26  ;;  %v1496_v49 = vadd.f32 %v4252_v17, %v1347_v4  ;;  %v4398_v21 = vld [vmem:[#allocation2 + $0x18] sm:$0xff]  ;;  %v4415_v56 = vpop.f32.mrf.mxu1  ;;  %v1782_v36 = vrot.slane %v1780_v14, 4 }
 0x1b1   : > { %1857 = vst.msk [vmem:[#allocation2 + $0x20] sm:$0xf] %vm1672_vm4, %v1781_v40  ;;  %3453 = vmatmul.msk.bf16.gmra.mxu3 %vm1973_vm0, %v4398_v21  ;;  %v2117_v17 = vrot.slane %v4398_v21, 1  ;;  %v4410_v23 = vld [vmem:[#allocation2 + $0x18] sm:$0xff]  ;;  %v1942_v5 = vshll.u32 %v4398_v21, 16  ;;  %v1066_v6 = vadd.f32 %v4156_v29, %v931_v3 }
 0x1b2   : > { %v1784_v61 = vshrl.u32 %v1697_v25, 16  ;;  %v1787_v48 = vshll.u32 %v1697_v25, 16  ;;  %v1564_v37 = vadd.f32 %v4184_v8, %v1496_v49  ;;  %v2939_v50 = vrot.slane %v4410_v23, 3 }
 0x1b3   : > { %v2118_v41 = vsel %vm1116_vm3, %v2115_v52, %v2117_v17  ;;  %v1944_v16 = vrot.slane %v1942_v5, 1 }
 0x1b4   : > { %v1786_v28 = vrot.slane %v1784_v61, 6  ;;  %v1789_v2 = vrot.slane %v1787_v48, 7  ;;  %v1577_v19 = vmax.f32 %v1564_v37, 0.0  ;;  %3460 = vmatmul.msk.bf16.gmra.mxu0 %vm1973_vm0, %v2118_v41  ;;  %v4440_v29 = vsel %vm2935_vm5, %v2937_v59, %v2939_v50  ;;  %v1647_v61 = vpop.permute.xlu1 %1646 }
 0x1b5   : > { %v1329_v32 = vpop.f32.mrf.mxu3  ;;  %v1945_v47 = vsel %vm545_vm2, %v1940_v57, %v1944_v16 }
 0x1b6   : > { %v1790_v9 = vor.u32 %v1789_v2, %v1786_v28  ;;  %v1668_v44 = vmul.f32 %v1642_v54, %v1577_v19  ;;  %v1348_v45 = vadd.f32 %v1329_v32, %v4158_v31  ;;  %3445 = vmatmul.msk.bf16.gmra.mxu2 %vm1973_vm0, %v1945_v47 }
 0x1b8   : > { %v1791_v52 = vsel %vm4217_vm15, %v1782_v36, %v1790_v9  ;;  %v1698_v14 = vpack.c.bf16 %v1668_v44, %v1668_v44  ;;  %v1497_v26 = vadd.f32 %v4278_v13, %v1348_v45  ;;  %v4432_v15 = vld [vmem:[#allocation2 + $0x1c] sm:$0xff]  ;;  %v1208_v13 = vadd.f32 %v4165_v12, %v1066_v6  ;;  %v4445_v25 = vpop.f32.mrf.mxu1 }
 0x1b9   : > { %1858 = vst.msk [vmem:[#allocation2 + $0x24] sm:$0xf] %vm1672_vm4, %v1791_v52  ;;  %v2258_v40 = vrot.slane %v4432_v15, 1  ;;  %v2506_v49 = vrot.slane %v4432_v15, 2  ;;  %v2379_v37 = vshrl.u32 %v4432_v15, 16  ;;  %v2382_v3 = vshll.u32 %v4432_v15, 16 }
 0x1ba   : > { %v1794_v31 = vshrl.u32 %v1698_v14, 16  ;;  %v1797_v4 = vshll.u32 %v1698_v14, 16  ;;  %v1565_v63 = vadd.f32 %v4184_v8, %v1497_v26  ;;  %v1792_v30 = vrot.slane %v1790_v9, 4 }
 0x1bb   : > { %v2259_v59 = vsel %vm1116_vm3, %v2256_v22, %v2258_v40  ;;  %v4459_v12 = vsel %vm2500_vm1, %v2504_v42, %v2506_v49  ;;  %v2381_v22 = vrot.slane %v2379_v37, 1  ;;  %v2384_v19 = vrot.slane %v2382_v3, 2 }
 0x1bc   : > { %v1796_v0 = vrot.slane %v1794_v31, 6  ;;  %v1799_v1 = vrot.slane %v1797_v4, 7  ;;  %v1578_v60 = vmax.f32 %v1565_v63, 0.0  ;;  %3488 = vmatmul.msk.bf16.gmra.mxu1 %vm1973_vm0, %v2259_v59  ;;  %v1946_v45 = vshrl.u32 %v4398_v21, 16  ;;  %v1652_v4 = vpop.permute.xlu2 %1651 }
 0x1bd   : > { %v1331_v48 = vpop.f32.mrf.mxu3  ;;  %v4469_v42 = vor.u32 %v2384_v19, %v2381_v22 }
 0x1be   : > { %v1800_v5 = vor.u32 %v1799_v1, %v1796_v0  ;;  %v1669_v28 = vmul.f32 %v1647_v61, %v1578_v60  ;;  %v1349_v2 = vadd.f32 %v1331_v48, %v1208_v13  ;;  %v1948_v13 = vor.u32 %v1946_v45, %v1944_v16 }
 0x1bf   : > { %v4482_v47 = vsel %vm1357_vm6, %v4393_v38, %v4469_v42 }
 0x1c0   : > { %v1801_v41 = vsel %vm4217_vm15, %v1792_v30, %v1800_v5  ;;  %v1699_v54 = vpack.c.bf16 %v1669_v28, %v1669_v28  ;;  %v1498_v36 = vadd.f32 %v4320_v10, %v1349_v2  ;;  %v4466_v55 = vld [vmem:[#allocation2 + $0x20] sm:$0xff]  ;;  %v4477_v10 = vpop.f32.mrf.mxu1  ;;  %v1802_v1 = vrot.slane %v1800_v5, 4 }
 0x1c1   : > { %1859 = vst.msk [vmem:[#allocation2 + $0x28] sm:$0xf] %vm1672_vm4, %v1801_v41  ;;  %3454 = vmatmul.msk.bf16.gmra.mxu3 %vm1973_vm0, %v4466_v55  ;;  %v2119_v44 = vrot.slane %v4466_v55, 1  ;;  %v1950_v6 = vshll.u32 %v4466_v55, 16  ;;  %v4492_v48 = vld [vmem:[#allocation2 + $0x20] sm:$0xff] }
 0x1c2   : > { %v1804_v32 = vshrl.u32 %v1699_v54, 16  ;;  %v1807_v57 = vshll.u32 %v1699_v54, 16  ;;  %v1566_v9 = vadd.f32 %v4184_v8, %v1498_v36  ;;  %v2941_v19 = vrot.slane %v4492_v48, 3 }
 0x1c3   : > { %v2120_v31 = vsel %vm1116_vm3, %v2117_v17, %v2119_v44  ;;  %v1952_v0 = vrot.slane %v1950_v6, 1 }
 0x1c4   : > { %v1806_v52 = vrot.slane %v1804_v32, 6  ;;  %v1809_v14 = vrot.slane %v1807_v57, 7  ;;  %v1579_v26 = vmax.f32 %v1566_v9, 0.0  ;;  %3461 = vmatmul.msk.bf16.gmra.mxu0 %vm1973_vm0, %v2120_v31  ;;  %v1657_v32 = vpop.permute.xlu0 %1656  ;;  %v3501_v9 = vld [vmem:[%s4878_s4 + $0x14] sm:$0xf] }
 0x1c5   : > { %v1334_v63 = vpop.f32.mrf.mxu3  ;;  %v1953_v61 = vsel %vm545_vm2, %v1948_v13, %v1952_v0 }
 0x1c6   : > { %v1810_v60 = vor.u32 %v1809_v14, %v1806_v52  ;;  %v1670_v59 = vmul.f32 %v1652_v4, %v1579_v26  ;;  %v1350_v38 = vadd.f32 %v1334_v63, %v4173_v11  ;;  %3446 = vmatmul.msk.bf16.gmra.mxu2 %vm1973_vm0, %v1953_v61  ;;  %v4529_v4 = vsel %vm2935_vm5, %v2939_v50, %v2941_v19 }
 0x1c8   : > { %v1811_v21 = vsel %vm4217_vm15, %v1802_v1, %v1810_v60  ;;  %v1700_v37 = vpack.c.bf16 %v1670_v59, %v1670_v59  ;;  %v1499_v17 = vadd.f32 %v4360_v20, %v1350_v38  ;;  %v4498_v3 = vld [vmem:[#allocation2 + $0x24] sm:$0xff]  ;;  %v4503_v28 = vpop.f32.mrf.mxu1  ;;  %v1812_v57 = vrot.slane %v1810_v60, 4 }
 0x1c9   : > { %1860 = vst.msk [vmem:[#allocation2 + $0x2c] sm:$0xf] %vm1672_vm4, %v1811_v21  ;;  %v2260_v5 = vrot.slane %v4498_v3, 1  ;;  %v2508_v2 = vrot.slane %v4498_v3, 2  ;;  %v2388_v22 = vshrl.u32 %v4498_v3, 16  ;;  %v2391_v20 = vshll.u32 %v4498_v3, 16 }
 0x1ca   : > { %v1814_v16 = vshrl.u32 %v1700_v37, 16  ;;  %v1817_v30 = vshll.u32 %v1700_v37, 16  ;;  %v1567_v11 = vadd.f32 %v4184_v8, %v1499_v17  ;;  %v1954_v1 = vshrl.u32 %v4466_v55, 16 }
 0x1cb   : > { %v2261_v8 = vsel %vm1116_vm3, %v2258_v40, %v2260_v5  ;;  %v4523_v6 = vsel %vm2500_vm1, %v2506_v49, %v2508_v2  ;;  %v2390_v52 = vrot.slane %v2388_v22, 1  ;;  %v2536_v40 = vsel %vm1995_vm7, %v3501_v9, 0 }
 0x1cc   : > { %v1816_v41 = vrot.slane %v1814_v16, 6  ;;  %v1819_v54 = vrot.slane %v1817_v30, 7  ;;  %v1580_v36 = vmax.f32 %v1567_v11, 0.0  ;;  %3489 = vmatmul.msk.bf16.gmra.mxu1 %vm1973_vm0, %v2261_v8  ;;  %v2393_v31 = vrot.slane %v2391_v20, 2  ;;  %2545 = vmatpush.bf16.msra.mxu3 %v2536_v40 }
 0x1cd   : > { %v1336_v45 = vpop.f32.mrf.mxu3  ;;  %v1956_v21 = vor.u32 %v1954_v1, %v1952_v0  ;;  %v1865_v0 = vld [vmem:[#allocation2 + $0x34] sm:$0xf] }
 0x1ce   : > { %v1820_v14 = vor.u32 %v1819_v54, %v1816_v41  ;;  %v1671_v26 = vmul.f32 %v1657_v32, %v1580_v36  ;;  %v2394_v49 = vor.u32 %v2393_v31, %v2390_v52 }
 0x1d0   : > { %v1821_v63 = vsel %vm4217_vm15, %v1812_v57, %v1820_v14  ;;  %v1701_v13 = vpack.c.bf16 %v1671_v26, %v1671_v26  ;;  %v4533_v15 = vld [vmem:[#allocation2 + $0x28] sm:$0xff]  ;;  %v4543_v37 = vpop.f32.mrf.mxu1  ;;  %v4547_v17 = vsel %vm1357_vm6, %v4469_v42, %v2394_v49  ;;  %v1822_v20 = vrot.slane %v1820_v14, 4 }
 0x1d1   : > { %1861 = vst.msk [vmem:[#allocation2 + $0x30] sm:$0xf] %vm1672_vm4, %v1821_v63  ;;  %3455 = vmatmul.msk.bf16.gmra.mxu3 %vm1973_vm0, %v4533_v15  ;;  %v2121_v38 = vrot.slane %v4533_v15, 1  ;;  %v1958_v50 = vshll.u32 %v4533_v15, 16  ;;  %v4541_v61 = vld [vmem:[#allocation2 + $0x28] sm:$0xff] }
 0x1d2   : > { %v1824_v60 = vshrl.u32 %v1701_v13, 16  ;;  %v1827_v59 = vshll.u32 %v1701_v13, 16  ;;  %v2943_v36 = vrot.slane %v4541_v61, 3 }
 0x1d3   : > { %v2122_v11 = vsel %vm1116_vm3, %v2119_v44, %v2121_v38  ;;  %v1960_v22 = vrot.slane %v1958_v50, 1  ;;  %v3564_v50 = vld [vmem:[#allocation2 + $0x38] sm:$0xf] }
 0x1d4   : > { %v1826_v16 = vrot.slane %v1824_v60, 6  ;;  %v1829_v30 = vrot.slane %v1827_v59, 7  ;;  %3462 = vmatmul.msk.bf16.gmra.mxu0 %vm1973_vm0, %v2122_v11  ;;  %v4562_v8 = vsel %vm2935_vm5, %v2941_v19, %v2943_v36  ;;  %v3509_v11 = vld [vmem:[%s4878_s4 + $0x18] sm:$0xf] }
 0x1d5   : > { %v1961_v54 = vsel %vm545_vm2, %v1956_v21, %v1960_v22  ;;  %v3640_v21 = vld [vmem:[#allocation2 + $0x38] sm:$0x10] }
 0x1d6   : > { %v1830_v41 = vor.u32 %v1829_v30, %v1826_v16  ;;  %3447 = vmatmul.msk.bf16.gmra.mxu2 %vm1973_vm0, %v1961_v54  ;;  %v1962_v54 = vshrl.u32 %v4533_v15, 16  ;;  %v3573_v15 = vld [vmem:[%s4878_s4 + $0x20] sm:$0xf] }
 0x1d8   : > { %v1831_v42 = vsel %vm4217_vm15, %v1822_v20, %v1830_v41  ;;  %v4559_v55 = vld [vmem:[#allocation2 + $0x2c] sm:$0xff]  ;;  %v4568_v40 = vpop.f32.mrf.mxu1  ;;  %v2677_v20 = vsel %vm1995_vm7, %v3509_v11, 0 }
 0x1d9   : > { %v1882_v44 = vld [vmem:[#allocation2 + $0x30] sm:$0x7]  ;;  %v1866_v32 = vsel %vm1864_vm12, %v1831_v42, %v1865_v0  ;;  %v2262_v45 = vrot.slane %v4559_v55, 1  ;;  %v2510_v52 = vrot.slane %v4559_v55, 2  ;;  %v2397_v14 = vshrl.u32 %v4559_v55, 16  ;;  %2686 = vmatpush.bf16.msra.mxu0 %v2677_v20 }
 0x1da   : > { %v1880_v57 = vld [vmem:[#allocation2 + $0x30] sm:$0x3]  ;;  %v1910_v9 = vunpack.c.l.b16 %v1882_v44  ;;  %1867 = vst [vmem:[#allocation2 + $0x34] sm:$0xf] %v1866_v32  ;;  %v2400_v51 = vshll.u32 %v4559_v55, 16  ;;  %v4594_v0 = vor.u32 %v3640_v21, %v3564_v50 }
 0x1db   : > { %v2263_v19 = vsel %vm1116_vm3, %v2260_v5, %v2262_v45  ;;  %v2043_v31 = vunpack.c.l.b16 %v1880_v57  ;;  %v4578_v63 = vsel %vm2500_vm1, %v2508_v2, %v2510_v52  ;;  %v2399_v13 = vrot.slane %v2397_v14, 1  ;;  %v3629_v11 = vld [vmem:[#allocation2 + $0x8] sm:$0xf0] }
 0x1dc   : > { %v1917_v26 = vpack.c.b16 %v1910_v9, %v1910_v9  ;;  %3490 = vmatmul.msk.bf16.gmra.mxu1 %vm1973_vm0, %v2263_v19  ;;  %v2402_v1 = vrot.slane %v2400_v51, 2  ;;  %v2947_v14 = vrot.slane %v4594_v0, 3 }
 0x1dd   : > { %v2044_v16 = vpack.c.b16 %v2043_v31, %v2043_v31 }
 0x1de   : > { %v1966_v60 = vshll.u32 %v1917_v26, 16  ;;  %v4581_v59 = vor.u32 %v2402_v1, %v2399_v13  ;;  %v2123_v30 = vrot.slane %v1917_v26, 1  ;;  %v1970_v21 = vshrl.u32 %v1917_v26, 16 }
 0x1df   : > { %v2799_v26 = vshll.u32 %v4331_v33, 16 }
 0x1e0   : > { %v4588_v3 = vsel %vm1357_vm6, %v2394_v49, %v4581_v59  ;;  %v1968_v42 = vrot.slane %v1966_v60, 1  ;;  %v4597_v44 = vpop.f32.mrf.mxu1  ;;  %v2124_v32 = vsel %vm1116_vm3, %v2121_v38, %v2123_v30  ;;  %v1964_v49 = vor.u32 %v1962_v54, %v1960_v22  ;;  %v3541_v38 = vld [vmem:[%s4878_s4 + $0x1c] sm:$0xf]  ;;  %v3512_v54 = vld [vmem:[#allocation2 + $0x8] sm:$0xc] }
 0x1e1   : > { %v2217_v5 = vld [vmem:[#allocation2 + $0x34] sm:$0x7]  ;;  %3456 = vmatmul.msk.bf16.gmra.mxu3 %vm1973_vm0, %v2044_v16  ;;  %v2971_v22 = vsel %vm1995_vm7, %v3573_v15, 0  ;;  %v2871_v13 = vsel %vm1995_vm7, %v3541_v38, 0  ;;  %v2801_v15 = vrot.slane %v2799_v26, 3  ;;  %v3632_v26 = vld [vmem:[#allocation2 + $0x20] sm:$0xff] }
 0x1e2   : > { %v2245_v2 = vunpack.c.l.b16 %v2217_v5  ;;  %v4592_v41 = vld [vmem:[#allocation2 + $0x30] sm:$0xff]  ;;  %v1969_v51 = vsel %vm545_vm2, %v1964_v49, %v1968_v42  ;;  %2980 = vmatpush.bf16.msra.mxu2 %v2971_v22  ;;  %2880 = vmatpush.bf16.msra.mxu1 %v2871_v13  ;;  %v1972_v16 = vor.u32 %v1970_v21, %v1968_v42  ;;  %v2735_v5 = vld [vmem:[#allocation2 + $0x8] sm:$0xc]  ;;  %vm2786_vm2 = vsmask.f32 5376  ;;  %v3631_v13 = vld [vmem:[#allocation2 + $0x18] sm:$0xff] }
 0x1e3   : > { %v2945_v9 = vrot.slane %v4592_v41, 3  ;;  %v2765_v20 = vunpack.c.l.b16 %v2735_v5  ;;  %v2808_v21 = vshll.u32 %v4410_v23, 16 }
 0x1e4   : > { %v2252_v57 = vpack.c.b16 %v2245_v2, %v2245_v2  ;;  %3463 = vmatmul.msk.bf16.gmra.mxu0 %vm1973_vm0, %v2124_v32  ;;  %v3630_v2 = vld [vmem:[#allocation2 + $0x10] sm:$0xff] }
 0x1e5   : > { %v4612_v31 = vsel %vm2935_vm5, %v2943_v36, %v2945_v9  ;;  %v4619_v1 = vsel %vm2935_vm5, %v2945_v9, %v2947_v14  ;;  %v2779_v32 = vpack.c.b16 %v2766_v39, %v2765_v20 }
 0x1e6   : > { %3448 = vmatmul.msk.bf16.gmra.mxu2 %vm1973_vm0, %v1969_v51  ;;  %v2264_v19 = vrot.slane %v2252_v57, 1  ;;  %v2643_v57 = vrot.slane %v3630_v2, 2 }
 0x1e7   : > { %v2788_v42 = vshrl.u32 %v2779_v32, 16  ;;  %v2791_v49 = vshll.u32 %v2779_v32, 16 }
 0x1e8   : > { %v4621_v60 = vpop.f32.mrf.mxu1  ;;  %v2265_v50 = vsel %vm1116_vm3, %v2262_v45, %v2264_v19  ;;  %v3513_v45 = vor.u32 %v3629_v11, %v3512_v54  ;;  %v2810_v11 = vrot.slane %v2808_v21, 3 }
 0x1e9   : > { %v2790_v62 = vrot.slane %v2788_v42, 2  ;;  %v2793_v39 = vrot.slane %v2791_v49, 3  ;;  %v2647_v42 = vrot.slane %v3632_v26, 2  ;;  %v2814_v49 = vshrl.u32 %v4492_v48, 16 }
 0x1ec   : > { %3491 = vmatmul.msk.bf16.gmra.mxu1 %vm1973_vm0, %v2265_v50  ;;  %v2645_v50 = vrot.slane %v3631_v13, 2 }
 0x1f0   : > { %v1549_v36 = vpop.f32.mrf.mxu1 }
 0x1f1   : > { %3502 = vmatmul.msk.bf16.vlgmr.msra.gmra.mxu3 %vm1973_vm0, %v4309_v58  ;;  %v2796_v58 = vshrl.u32 %v4331_v33, 16  ;;  %v2794_v33 = vor.u32 %v2793_v39, %v2790_v62  ;;  %v2805_v36 = vshrl.u32 %v4410_v23, 16  ;;  %v2648_v62 = vsel %vm2500_vm1, %v2645_v50, %v2647_v42 }
 0x1f2   : > { %v2816_v39 = vrot.slane %v2814_v49, 2 }
 0x1f3   : > { %v2807_v5 = vrot.slane %v2805_v36, 2 }
 0x1f4   : > { %3464 = vmatmul.msk.bf16.gmra.mxu0 %vm1973_vm0, %v2123_v30  ;;  %v2642_v30 = vrot.slane %v3513_v45, 2 }
 0x1f5   : > { %v2811_v20 = vor.u32 %v2810_v11, %v2807_v5 }
 0x1f6   : > { %3449 = vmatmul.msk.bf16.gmra.mxu2 %vm1973_vm0, %v1972_v16  ;;  %v2644_v51 = vsel %vm2500_vm1, %v2642_v30, %v2643_v57 }
 0x1fc   : > { %3492 = vmatmul.msk.bf16.gmra.mxu1 %vm1973_vm0, %v2264_v19  ;;  %v2798_v19 = vrot.slane %v2796_v58, 2 }
 0x1fe   : > { %v2802_v38 = vor.u32 %v2801_v15, %v2798_v19 }
 0x200   : > { %v2812_v23 = vsel %vm2786_vm2, %v2802_v38, %v2811_v20 }
 0x201   : > { %3503 = vmatmul.msk.bf16.gmra.mxu3 %vm1973_vm0, %v4390_v18  ;;  %v2803_v18 = vsel %vm2786_vm2, %v2794_v33, %v2802_v38 }
 0x204   : > { %v2072_v9 = vpop.f32.mrf.mxu3  ;;  %3534 = vmatmul.msk.bf16.vlgmr.msra.gmra.mxu0 %vm1973_vm0, %v2644_v51  ;;  %v2817_v51 = vshll.u32 %v4492_v48, 16 }
 0x206   : > { %3494 = vmatmul.msk.bf16.vlgmr.msrb.gmra.mxu2 %vm1973_vm0, %v4325_v24  ;;  %v2646_v24 = vsel %vm2500_vm1, %v2643_v57, %v2645_v50  ;;  %v2819_v38 = vrot.slane %v2817_v51, 3 }
 0x208   : > { %v2820_v48 = vor.u32 %v2819_v38, %v2816_v39  ;;  %v3634_v38 = vld [vmem:[#allocation2 + $0x30] sm:$0xff] }
 0x20c   : > { %v2074_v22 = vpop.f32.mrf.mxu3  ;;  %3566 = vmatmul.msk.bf16.vlgmr.msra.gmra.mxu1 %vm1973_vm0, %v2803_v18 }
 0x211   : > { %v2158_v16 = vpop.f32.mrf.mxu0  ;;  %3504 = vmatmul.msk.bf16.gmra.mxu3 %vm1973_vm0, %v4459_v12 }
 0x214   : > { %v2077_v2 = vpop.f32.mrf.mxu3  ;;  %3535 = vmatmul.msk.bf16.gmra.mxu0 %vm1973_vm0, %v2646_v24  ;;  %v3633_v24 = vld [vmem:[#allocation2 + $0x28] sm:$0xff] }
 0x216   : > { %3495 = vmatmul.msk.bf16.gmra.mxu2 %vm1973_vm0, %v4404_v53 }
 0x219   : > { %v2160_v54 = vpop.f32.mrf.mxu0  ;;  %v2299_v45 = vpop.f32.mrf.mxu1 }
 0x21a   : > { %v2008_v32 = vpop.f32.mrf.mxu2 }
 0x21b   : > { %v2073_v58 = vadd.f32 %v2072_v9, %v2008_v32  ;;  %v2826_v32 = vshll.u32 %v4541_v61, 16 }
 0x21c   : > { %v2079_v30 = vpop.f32.mrf.mxu3  ;;  %3567 = vmatmul.msk.bf16.gmra.mxu1 %vm1973_vm0, %v2812_v23 }
 0x21d   : > { %v2192_v12 = vadd.f32 %v2158_v16, %v2073_v58  ;;  %v2828_v49 = vrot.slane %v2826_v32, 3 }
 0x21f   : > { %v4652_v57 = vadd.f32 %v2299_v45, %v2192_v12  ;;  %v2823_v45 = vshrl.u32 %v4541_v61, 16 }
 0x221   : > { %v2163_v53 = vpop.f32.mrf.mxu0  ;;  %v2301_v19 = vpop.f32.mrf.mxu1  ;;  %3505 = vmatmul.msk.bf16.gmra.mxu3 %vm1973_vm0, %v4523_v6  ;;  %v2825_v12 = vrot.slane %v2823_v45, 2 }
 0x222   : > { %v2010_v9 = vpop.f32.mrf.mxu2 }
 0x223   : > { %v2075_v15 = vadd.f32 %v2074_v22, %v2010_v9  ;;  %v2821_v22 = vsel %vm2786_vm2, %v2811_v20, %v2820_v48  ;;  %v2829_v61 = vor.u32 %v2828_v49, %v2825_v12 }
 0x224   : > { %v2082_v33 = vpop.f32.mrf.mxu3  ;;  %3536 = vmatmul.msk.bf16.gmra.mxu0 %vm1973_vm0, %v2648_v62 }
 0x225   : > { %v2193_v18 = vadd.f32 %v2160_v54, %v2075_v15  ;;  %v2649_v54 = vrot.slane %v3633_v24, 2 }
 0x226   : > { %3496 = vmatmul.msk.bf16.gmra.mxu2 %vm1973_vm0, %v4482_v47 }
 0x227   : > { %v4660_v13 = vadd.f32 %v2301_v19, %v2193_v18  ;;  %v2650_v26 = vsel %vm2500_vm1, %v2647_v42, %v2649_v54  ;;  %v2830_v42 = vsel %vm2786_vm2, %v2820_v48, %v2829_v61 }
 0x229   : > { %v2165_v36 = vpop.f32.mrf.mxu0  ;;  %v2304_v21 = vpop.f32.mrf.mxu1 }
 0x22a   : > { %v2013_v16 = vpop.f32.mrf.mxu2 }
 0x22b   : > { %v2078_v6 = vadd.f32 %v2077_v2, %v2013_v16  ;;  %v2346_v2 = vld [vmem:[#allocation2 + $0x34] sm:$0xff]  }
 0x22c   : > { %v2084_v50 = vpop.f32.mrf.mxu3  ;;  %3568 = vmatmul.msk.bf16.gmra.mxu1 %vm1973_vm0, %v2821_v22  ;;  %v2832_v22 = vshrl.u32 %v4592_v41, 16 }
 0x22d   : > { %v2194_v5 = vadd.f32 %v2163_v53, %v2078_v6  ;;  %v2350_v53 = vunpack.c.l.b16 %v2346_v2  ;;  %v2651_v6 = vrot.slane %v3634_v38, 2 }
 0x22f   : > { %v4666_v11 = vadd.f32 %v2304_v21, %v2194_v5  ;;  %v2351_v15 = vpack.c.b16 %v2350_v53, %v2350_v53  ;;  %v2652_v32 = vsel %vm2500_vm1, %v2649_v54, %v2651_v6 }
 0x231   : > { %v2168_v47 = vpop.f32.mrf.mxu0  ;;  %v2306_v58 = vpop.f32.mrf.mxu1  ;;  %3506 = vmatmul.msk.bf16.gmra.mxu3 %vm1973_vm0, %v4578_v63  ;;  %v2512_v21 = vrot.slane %v2351_v15, 2  ;;  %v2406_v53 = vshrl.u32 %v2351_v15, 16 }
 0x232   : > { %v2015_v23 = vpop.f32.mrf.mxu2 }
 0x233   : > { %v2080_v20 = vadd.f32 %v2079_v30, %v2015_v23  ;;  %v2513_v24 = vsel %vm2500_vm1, %v2510_v52, %v2512_v21  ;;  %v2634_v52 = vunpack.c.h.b16 %v2346_v2  ;;  %v2841_v2 = vshrl.u32 %v4594_v0, 16 }
 0x234   : > { %v2087_v51 = vpop.f32.mrf.mxu3  ;;  %3537 = vmatmul.msk.bf16.gmra.mxu0 %vm1973_vm0, %v2650_v26 }
 0x235   : > { %v2195_v19 = vadd.f32 %v2165_v36, %v2080_v20 }
 0x236   : > { %3497 = vmatmul.msk.bf16.gmra.mxu2 %vm1973_vm0, %v4547_v17  ;;  %v2835_v17 = vshll.u32 %v4592_v41, 16 }
 0x237   : > { %v4674_v9 = vadd.f32 %v2306_v58, %v2195_v19 }
 0x238   : > { %v2837_v58 = vrot.slane %v2835_v17, 3 }
 0x239   : > { %v2170_v63 = vpop.f32.mrf.mxu0  ;;  %v2309_v62 = vpop.f32.mrf.mxu1 }
 0x23a   : > { %v2018_v39 = vpop.f32.mrf.mxu2 }
 0x23b   : > { %v2083_v30 = vadd.f32 %v2082_v33, %v2018_v39 }
 0x23c   : > { %v2089_v18 = vpop.f32.mrf.mxu3  ;;  %3569 = vmatmul.msk.bf16.gmra.mxu1 %vm1973_vm0, %v2830_v42 }
 0x23d   : > { %v2196_v16 = vadd.f32 %v2168_v47, %v2083_v30  ;;  %v2834_v47 = vrot.slane %v2832_v22, 2  ;;  %v2408_v30 = vrot.slane %v2406_v53, 1 }
 0x23f   : > { %v4680_v36 = vadd.f32 %v2309_v62, %v2196_v16  ;;  %v2838_v55 = vor.u32 %v2837_v58, %v2834_v47  ;;  %v2641_v62 = vpack.c.b16 %v2634_v52, %v2634_v52  ;;  %v2844_v16 = vshll.u32 %v4594_v0, 16 }
 0x241   : > { %v2173_v33 = vpop.f32.mrf.mxu0  ;;  %v2311_v5 = vpop.f32.mrf.mxu1  ;;  %3507 = vmatmul.msk.bf16.gmra.mxu3 %vm1973_vm0, %v2513_v24  ;;  %v2839_v54 = vsel %vm2786_vm2, %v2829_v61, %v2838_v55 }
 0x242   : > { %v2020_v48 = vpop.f32.mrf.mxu2 }
 0x243   : > { %v2085_v45 = vadd.f32 %v2084_v50, %v2020_v48  ;;  %v2409_v50 = vshll.u32 %v2351_v15, 16 }
 0x244   : > { %v2092_v23 = vpop.f32.mrf.mxu3  ;;  %3538 = vmatmul.msk.bf16.gmra.mxu0 %vm1973_vm0, %v2652_v32 }
 0x245   : > { %v2197_v20 = vadd.f32 %v2170_v63, %v2085_v45  ;;  %v2411_v42 = vrot.slane %v2409_v50, 2 }
 0x246   : > { %3498 = vmatmul.msk.bf16.gmra.mxu2 %vm1973_vm0, %v4588_v3  ;;  %v2653_v3 = vrot.slane %v2641_v62, 2 }
 0x247   : > { %v4690_v26 = vadd.f32 %v2311_v5, %v2197_v20  ;;  %v2412_v61 = vor.u32 %v2411_v42, %v2408_v30  ;;  %v2843_v5 = vrot.slane %v2841_v2, 2 }
 0x248   : > { %v2654_v24 = vsel %vm2500_vm1, %v2651_v6, %v2653_v3 }
 0x249   : > { %v2175_v41 = vpop.f32.mrf.mxu0  ;;  %v2314_v12 = vpop.f32.mrf.mxu1  ;;  %v2413_v32 = vsel %vm1357_vm6, %v4581_v59, %v2412_v61 }
 0x24a   : > { %v2023_v49 = vpop.f32.mrf.mxu2 }
 0x24b   : > { %v2088_v19 = vadd.f32 %v2087_v51, %v2023_v49 }
 0x24c   : > { %v2094_v39 = vpop.f32.mrf.mxu3  ;;  %3570 = vmatmul.msk.bf16.gmra.mxu1 %vm1973_vm0, %v2839_v54 }
 0x24d   : > { %v2198_v63 = vadd.f32 %v2173_v33, %v2088_v19  ;;  %v2846_v33 = vrot.slane %v2844_v16, 3 }
 0x24f   : > { %v4696_v38 = vadd.f32 %v2314_v12, %v2198_v63  ;;  %v2847_v58 = vor.u32 %v2846_v33, %v2843_v5 }
 0x251   : > { %v2178_v22 = vpop.f32.mrf.mxu0  ;;  %v2316_v17 = vpop.f32.mrf.mxu1  ;;  %3508 = vmatmul.msk.bf16.gmra.mxu3 %vm1973_vm0, %v2512_v21  ;;  %v2848_v6 = vsel %vm2786_vm2, %v2838_v55, %v2847_v58 }
 0x252   : > { %v2025_v51 = vpop.f32.mrf.mxu2 }
 0x253   : > { %v2090_v15 = vadd.f32 %v2089_v18, %v2025_v51 }
 0x254   : > { %v2097_v48 = vpop.f32.mrf.mxu3  ;;  %3539 = vmatmul.msk.bf16.gmra.mxu0 %vm1973_vm0, %v2654_v24 }
 0x255   : > { %v2199_v45 = vadd.f32 %v2175_v41, %v2090_v15 }
 0x256   : > { %3499 = vmatmul.msk.bf16.gmra.mxu2 %vm1973_vm0, %v2413_v32 }
 0x257   : > { %v4705_v47 = vadd.f32 %v2316_v17, %v2199_v45 }
 0x259   : > { %v2180_v21 = vpop.f32.mrf.mxu0  ;;  %v2319_v20 = vpop.f32.mrf.mxu1 }
 0x25a   : > { %v2028_v52 = vpop.f32.mrf.mxu2 }
 0x25b   : > { %v2093_v18 = vadd.f32 %v2092_v23, %v2028_v52 }
 0x25c   : > { %v2099_v12 = vpop.f32.mrf.mxu3  ;;  %3571 = vmatmul.msk.bf16.gmra.mxu1 %vm1973_vm0, %v2848_v6 }
 0x25d   : > { %v2200_v49 = vadd.f32 %v2178_v22, %v2093_v18 }
 0x25f   : > { %v4710_v53 = vadd.f32 %v2319_v20, %v2200_v49 }
 0x261   : > { %v2183_v41 = vpop.f32.mrf.mxu0  ;;  %v2321_v50 = vpop.f32.mrf.mxu1 }
 0x262   : > { %v2030_v59 = vpop.f32.mrf.mxu2 }
 0x263   : > { %v2095_v19 = vadd.f32 %v2094_v39, %v2030_v59 }
 0x264   : > { %v2102_v54 = vpop.f32.mrf.mxu3  ;;  %3540 = vmatmul.msk.bf16.gmra.mxu0 %vm1973_vm0, %v2653_v3 }
 0x265   : > { %v2201_v62 = vadd.f32 %v2180_v21, %v2095_v19 }
 0x266   : > { %3500 = vmatmul.msk.bf16.gmra.mxu2 %vm1973_vm0, %v2412_v61 }
 0x267   : > { %v4713_v63 = vadd.f32 %v2321_v50, %v2201_v62 }
 0x269   : > { %v2185_v23 = vpop.f32.mrf.mxu0  ;;  %v2324_v55 = vpop.f32.mrf.mxu1 }
 0x26a   : > { %v2033_v30 = vpop.f32.mrf.mxu2 }
 0x26b   : > { %v2098_v42 = vadd.f32 %v2097_v48, %v2033_v30 }
 0x26c   : > { %v2104_v2 = vpop.f32.mrf.mxu3  ;;  %3572 = vmatmul.msk.bf16.gmra.mxu1 %vm1973_vm0, %v2847_v58 }
 0x26d   : > { %v2202_v16 = vadd.f32 %v2183_v41, %v2098_v42 }
 0x26f   : > { %v4717_v22 = vadd.f32 %v2324_v55, %v2202_v16 }
 0x271   : > { %v2188_v17 = vpop.f32.mrf.mxu0  ;;  %v2326_v39 = vpop.f32.mrf.mxu1 }
 0x272   : > { %v2035_v51 = vpop.f32.mrf.mxu2 }
 0x273   : > { %v2100_v15 = vadd.f32 %v2099_v12, %v2035_v51 }
 0x274   : > { %v2547_v3 = vpop.f32.mrf.mxu3 }
 0x275   : > { %v2203_v24 = vadd.f32 %v2185_v23, %v2100_v15 }
 0x276   : > { %3574 = vmatmul.msk.bf16.vlgmr.msra.gmra.mxu2 %vm1973_vm0, %v4368_v43 }
 0x277   : > { %v4719_v5 = vadd.f32 %v2326_v39, %v2203_v24 }
 0x279   : > { %v2190_v61 = vpop.f32.mrf.mxu0  ;;  %v2329_v33 = vpop.f32.mrf.mxu1 }
 0x27a   : > { %v2038_v48 = vpop.f32.mrf.mxu2 }
 0x27b   : > { %v2103_v45 = vadd.f32 %v2102_v54, %v2038_v48 }
 0x27c   : > { %v2549_v32 = vpop.f32.mrf.mxu3 }
 0x27d   : > { %v2204_v58 = vadd.f32 %v2188_v17, %v2103_v45 }
 0x27f   : > { %v4723_v21 = vadd.f32 %v2329_v33, %v2204_v58 }
 0x281   : > { %v2331_v20 = vpop.f32.mrf.mxu1  ;;  %v2688_v52 = vpop.f32.mrf.mxu0 }
 0x282   : > { %v2040_v18 = vpop.f32.mrf.mxu2 }
 0x284   : > { %v2552_v6 = vpop.f32.mrf.mxu3 }
 0x286   : > { %3575 = vmatmul.msk.bf16.gmra.mxu2 %vm1973_vm0, %v4440_v29 }
 0x289   : > { %v2690_v12 = vpop.f32.mrf.mxu0  ;;  %v2882_v49 = vpop.f32.mrf.mxu1 }
 0x28a   : > { %v2447_v41 = vpop.f32.mrf.mxu2 }
 0x28b   : > { %v2481_v43 = vadd.f32 %v2447_v41, %v4652_v57 }
 0x28c   : > { %v2554_v50 = vpop.f32.mrf.mxu3 }
 0x28d   : > { %v2581_v59 = vadd.f32 %v2547_v3, %v2481_v43 }
 0x28f   : > { %v2722_v19 = vadd.f32 %v2688_v52, %v2581_v59 }
 0x291   : > { %v4728_v54 = vadd.f32 %v2882_v49, %v2722_v19  ;;  %v2693_v62 = vpop.f32.mrf.mxu0  ;;  %v2884_v23 = vpop.f32.mrf.mxu1 }
 0x292   : > { %v2449_v55 = vpop.f32.mrf.mxu2 }
 0x293   : > { %v2482_v30 = vadd.f32 %v2449_v55, %v4660_v13 }
 0x294   : > { %v2557_v42 = vpop.f32.mrf.mxu3 }
 0x295   : > { %v2582_v2 = vadd.f32 %v2549_v32, %v2482_v30 }
 0x296   : > { %3576 = vmatmul.msk.bf16.gmra.mxu2 %vm1973_vm0, %v4529_v4 }
 0x297   : > { %v2723_v16 = vadd.f32 %v2690_v12, %v2582_v2 }
 0x299   : > { %v4733_v29 = vadd.f32 %v2884_v23, %v2723_v16  ;;  %v2695_v17 = vpop.f32.mrf.mxu0  ;;  %v2887_v57 = vpop.f32.mrf.mxu1 }
 0x29a   : > { %v2452_v39 = vpop.f32.mrf.mxu2 }
 0x29b   : > { %v2483_v51 = vadd.f32 %v2452_v39, %v4666_v11 }
 0x29c   : > { %v2559_v15 = vpop.f32.mrf.mxu3 }
 0x29d   : > { %v2583_v3 = vadd.f32 %v2552_v6, %v2483_v51 }
 0x29f   : > { %v2724_v24 = vadd.f32 %v2693_v62, %v2583_v3 }
 0x2a1   : > { %v4736_v61 = vadd.f32 %v2887_v57, %v2724_v24  ;;  %v2698_v33 = vpop.f32.mrf.mxu0  ;;  %v2889_v13 = vpop.f32.mrf.mxu1 }
 0x2a2   : > { %v2454_v48 = vpop.f32.mrf.mxu2 }
 0x2a3   : > { %v2484_v45 = vadd.f32 %v2454_v48, %v4674_v9 }
 0x2a4   : > { %v2562_v32 = vpop.f32.mrf.mxu3 }
 0x2a5   : > { %v2584_v58 = vadd.f32 %v2554_v50, %v2484_v45 }
 0x2a6   : > { %3577 = vmatmul.msk.bf16.gmra.mxu2 %vm1973_vm0, %v4562_v8 }
 0x2a7   : > { %v2725_v4 = vadd.f32 %v2695_v17, %v2584_v58 }
 0x2a9   : > { %v4741_v20 = vadd.f32 %v2889_v13, %v2725_v4  ;;  %v2700_v52 = vpop.f32.mrf.mxu0  ;;  %v2892_v11 = vpop.f32.mrf.mxu1 }
 0x2aa   : > { %v2457_v18 = vpop.f32.mrf.mxu2 }
 0x2ab   : > { %v2485_v6 = vadd.f32 %v2457_v18, %v4680_v36 }
 0x2ac   : > { %v2564_v12 = vpop.f32.mrf.mxu3 }
 0x2ad   : > { %v2585_v49 = vadd.f32 %v2557_v42, %v2485_v6 }
 0x2af   : > { %v2726_v41 = vadd.f32 %v2698_v33, %v2585_v49 }
 0x2b1   : > { %v4744_v43 = vadd.f32 %v2892_v11, %v2726_v41  ;;  %v2703_v59 = vpop.f32.mrf.mxu0  ;;  %v2894_v9 = vpop.f32.mrf.mxu1 }
 0x2b2   : > { %v2459_v19 = vpop.f32.mrf.mxu2 }
 0x2b3   : > { %v2486_v50 = vadd.f32 %v2459_v19, %v4690_v26 }
 0x2b4   : > { %v2567_v62 = vpop.f32.mrf.mxu3 }
 0x2b5   : > { %v2586_v23 = vadd.f32 %v2559_v15, %v2486_v50 }
 0x2b6   : > { %3578 = vmatmul.msk.bf16.gmra.mxu2 %vm1973_vm0, %v4612_v31 }
 0x2b7   : > { %v2727_v8 = vadd.f32 %v2700_v52, %v2586_v23 }
 0x2b9   : > { %v4749_v55 = vadd.f32 %v2894_v9, %v2727_v8  ;;  %v2705_v30 = vpop.f32.mrf.mxu0  ;;  %v2897_v36 = vpop.f32.mrf.mxu1 }
 0x2ba   : > { %v2462_v2 = vpop.f32.mrf.mxu2 }
 0x2bb   : > { %v2487_v42 = vadd.f32 %v2462_v2, %v4696_v38 }
 0x2bc   : > { %v2569_v16 = vpop.f32.mrf.mxu3 }
 0x2bd   : > { %v2587_v17 = vadd.f32 %v2562_v32, %v2487_v42 }
 0x2bf   : > { %v2728_v57 = vadd.f32 %v2703_v59, %v2587_v17 }
 0x2c1   : > { %v4752_v39 = vadd.f32 %v2897_v36, %v2728_v57  ;;  %v2708_v51 = vpop.f32.mrf.mxu0  ;;  %v2899_v26 = vpop.f32.mrf.mxu1 }
 0x2c2   : > { %v2464_v3 = vpop.f32.mrf.mxu2 }
 0x2c3   : > { %v2488_v15 = vadd.f32 %v2464_v3, %v4705_v47 }
 0x2c4   : > { %v2572_v24 = vpop.f32.mrf.mxu3 }
 0x2c5   : > { %v2588_v33 = vadd.f32 %v2564_v12, %v2488_v15 }
 0x2c6   : > { %3579 = vmatmul.msk.bf16.gmra.mxu2 %vm1973_vm0, %v4619_v1 }
 0x2c7   : > { %v2729_v31 = vadd.f32 %v2705_v30, %v2588_v33 }
 0x2c9   : > { %v4757_v13 = vadd.f32 %v2899_v26, %v2729_v31  ;;  %v2710_v48 = vpop.f32.mrf.mxu0  ;;  %v2902_v38 = vpop.f32.mrf.mxu1  ;;  %v4785_v31 = vld [vmem:[%s4879_s5] ss:$0 sm:$0xff] }
 0x2ca   : > { %v2467_v45 = vpop.f32.mrf.mxu2 }
 0x2cb   : > { %v2489_v32 = vadd.f32 %v2467_v45, %v4710_v53 }
 0x2cc   : > { %v2574_v58 = vpop.f32.mrf.mxu3 }
 0x2cd   : > { %v2589_v4 = vadd.f32 %v2567_v62, %v2489_v32 }
 0x2cf   : > { %v2730_v52 = vadd.f32 %v2708_v51, %v2589_v4 }
 0x2d1   : > { %v4760_v11 = vadd.f32 %v2902_v38, %v2730_v52  ;;  %v2713_v18 = vpop.f32.mrf.mxu0  ;;  %v2904_v47 = vpop.f32.mrf.mxu1 }
 0x2d2   : > { %v2469_v6 = vpop.f32.mrf.mxu2 }
 0x2d3   : > { %v2490_v12 = vadd.f32 %v2469_v6, %v4713_v63 }
 0x2d4   : > { %v2577_v49 = vpop.f32.mrf.mxu3 }
 0x2d5   : > { %v2590_v41 = vadd.f32 %v2569_v16, %v2490_v12 }
 0x2d6   : > { %3580 = vmatmul.msk.bf16.gmra.mxu2 %vm1973_vm0, %v2947_v14 }
 0x2d7   : > { %v2731_v1 = vadd.f32 %v2710_v48, %v2590_v41 }
 0x2d9   : > { %v4766_v59 = vadd.f32 %v2904_v47, %v2731_v1  ;;  %v2715_v53 = vpop.f32.mrf.mxu0  ;;  %v2907_v9 = vpop.f32.mrf.mxu1 }
 0x2da   : > { %v2472_v19 = vpop.f32.mrf.mxu2 }
 0x2db   : > { %v2491_v50 = vadd.f32 %v2472_v19, %v4717_v22 }
 0x2dc   : > { %v2579_v62 = vpop.f32.mrf.mxu3 }
 0x2dd   : > { %v2591_v23 = vadd.f32 %v2572_v24, %v2491_v50 }
 0x2df   : > { %v2732_v8 = vadd.f32 %v2713_v18, %v2591_v23 }
 0x2e1   : > { %v4769_v30 = vadd.f32 %v2907_v9, %v2732_v8  ;;  %v2909_v63 = vpop.f32.mrf.mxu1  ;;  %v2718_v36 = vpop.f32.mrf.mxu0 }
 0x2e2   : > { %v2474_v2 = vpop.f32.mrf.mxu2 }
 0x2e3   : > { %v2492_v42 = vadd.f32 %v2474_v2, %v4719_v5  ;;  %v4780_v5 = vld [vmem:[%s4881_s7] ss:$0 sm:$0xff] }
 0x2e4   : > { %v1525_v9 = vadd.f32 %v4780_v5, %v4336_v34  ;;  %v1528_v23 = vadd.f32 %v4780_v5, %v4373_v7  ;;  %v1530_v2 = vadd.f32 %v4780_v5, %v4415_v56 }
 0x2e5   : > { %v2592_v0 = vadd.f32 %v2574_v58, %v2492_v42 }
 0x2e7   : > { %v2733_v14 = vadd.f32 %v2715_v53, %v2592_v0 }
 0x2e9   : > { %v4772_v16 = vadd.f32 %v2909_v63, %v2733_v14  ;;  %v2912_v17 = vpop.f32.mrf.mxu1  ;;  %v2720_v57 = vpop.f32.mrf.mxu0 }
 0x2ea   : > { %v2477_v51 = vpop.f32.mrf.mxu2 }
 0x2eb   : > { %v2493_v22 = vadd.f32 %v2477_v51, %v4723_v21  ;;  %v1518_v21 = vadd.f32 %v4780_v5, %v4249_v35  ;;  %v1520_v35 = vadd.f32 %v4780_v5, %v4269_v46 }
 0x2ed   : > { %v2593_v26 = vadd.f32 %v2577_v49, %v2493_v22  ;;  %v1523_v49 = vadd.f32 %v4780_v5, %v4294_v27 }
 0x2ef   : > { %v2734_v3 = vadd.f32 %v2718_v36, %v2593_v26  ;;  %v1535_v26 = vadd.f32 %v4780_v5, %v4477_v10 }
 0x2f1   : > { %v4775_v15 = vadd.f32 %v2912_v17, %v2734_v3  ;;  %v2914_v24 = vpop.f32.mrf.mxu1  ;;  %v1533_v17 = vadd.f32 %v4780_v5, %v4445_v25 }
 0x2f2   : > { %v2479_v33 = vpop.f32.mrf.mxu2 }
 0x2fa   : > { %v2982_v48 = vpop.f32.mrf.mxu2 }
 0x2fb   : > { %v3016_v38 = vadd.f32 %v2982_v48, %v4728_v54  ;;  %v1538_v48 = vadd.f32 %v4780_v5, %v4503_v28 }
 0x2fd   : > { %v3033_v45 = vadd.f32 %v4785_v31, %v3016_v38 }
 0x2ff   : > { %v3046_v32 = vadd.f32 %v3033_v45, %v1518_v21 }
 0x301   : > { %v3059_v58 = vmax.f32 %v3046_v32, 0.0  ;;  %v1540_v32 = vadd.f32 %v4780_v5, %v4543_v37 }
 0x302   : > { %v2984_v4 = vpop.f32.mrf.mxu2 }
 0x303   : > { %3072 = vst.msk [vmem:[%s4795_s25] sm:$0xff] %vm1973_vm0, %v3059_v58  ;;  %v3017_v54 = vadd.f32 %v2984_v4, %v4733_v29 }
 0x305   : > { %v3034_v52 = vadd.f32 %v4785_v31, %v3017_v54 }
 0x307   : > { %v3047_v18 = vadd.f32 %v3034_v52, %v1520_v35  ;;  %v1543_v35 = vadd.f32 %v4780_v5, %v4568_v40 }
 0x309   : > { %v3060_v47 = vmax.f32 %v3047_v18, 0.0 }
 0x30a   : > { %v2987_v6 = vpop.f32.mrf.mxu2 }
 0x30b   : > { %3073 = vst.msk [vmem:[%s4795_s25 + $0x8] sm:$0xff] %vm1973_vm0, %v3060_v47  ;;  %v3018_v12 = vadd.f32 %v2987_v6, %v4736_v61  ;;  %v1545_v6 = vadd.f32 %v4780_v5, %v4597_v44 }
 0x30d   : > { %v3035_v41 = vadd.f32 %v4785_v31, %v3018_v12 }
 0x30f   : > { %v3048_v1 = vadd.f32 %v3035_v41, %v1523_v49 }
 0x311   : > { %v3061_v29 = vmax.f32 %v3048_v1, 0.0  ;;  %v1548_v1 = vadd.f32 %v4780_v5, %v4621_v60 }
 0x312   : > { %v2989_v53 = vpop.f32.mrf.mxu2 }
 0x313   : > { %3074 = vst.msk [vmem:[%s4795_s25 + $0x10] sm:$0xff] %vm1973_vm0, %v3061_v29  ;;  %v3019_v46 = vadd.f32 %v2989_v53, %v4741_v20 }
 0x315   : > { %v3036_v19 = vadd.f32 %v4785_v31, %v3019_v46 }
 0x317   : > { %v3049_v50 = vadd.f32 %v3036_v19, %v1525_v9 }
 0x319   : > { %v3062_v61 = vmax.f32 %v3049_v50, 0.0 }
 0x31a   : > { %v2992_v62 = vpop.f32.mrf.mxu2 }
 0x31b   : > { %3075 = vst.msk [vmem:[%s4795_s25 + $0x18] sm:$0xff] %vm1973_vm0, %v3062_v61  ;;  %v3020_v27 = vadd.f32 %v2992_v62, %v4744_v43 }
 0x31d   : > { %v3037_v8 = vadd.f32 %v4785_v31, %v3020_v27 }
 0x31f   : > { %v3050_v63 = vadd.f32 %v3037_v8, %v1528_v23 }
 0x321   : > { %v3063_v20 = vmax.f32 %v3050_v63, 0.0 }
 0x322   : > { %v2994_v36 = vpop.f32.mrf.mxu2 }
 0x323   : > { %3076 = vst.msk [vmem:[%s4795_s25 + $0x20] sm:$0xff] %vm1973_vm0, %v3063_v20  ;;  %v3021_v34 = vadd.f32 %v2994_v36, %v4749_v55 }
 0x325   : > { %v3038_v42 = vadd.f32 %v4785_v31, %v3021_v34 }
 0x327   : > { %v3051_v0 = vadd.f32 %v3038_v42, %v1530_v2 }
 0x329   : > { %v3064_v43 = vmax.f32 %v3051_v0, 0.0 }
 0x32a   : > { %v2997_v14 = vpop.f32.mrf.mxu2 }
 0x32b   : > { %3077 = vst.msk [vmem:[%s4795_s25 + $0x28] sm:$0xff] %vm1973_vm0, %v3064_v43  ;;  %v3022_v7 = vadd.f32 %v2997_v14, %v4752_v39 }
 0x32d   : > { %v3039_v57 = vadd.f32 %v4785_v31, %v3022_v7 }
 0x32f   : > { %v3052_v51 = vadd.f32 %v3039_v57, %v1533_v17 }
 0x331   : > { %v3065_v55 = vmax.f32 %v3052_v51, 0.0 }
 0x332   : > { %v2999_v22 = vpop.f32.mrf.mxu2 }
 0x333   : > { %3078 = vst.msk [vmem:[%s4795_s25 + $0x30] sm:$0xff] %vm1973_vm0, %v3065_v55  ;;  %v3023_v56 = vadd.f32 %v2999_v22, %v4757_v13 }
 0x335   : > { %v3040_v3 = vadd.f32 %v4785_v31, %v3023_v56 }
 0x337   : > { %v3053_v24 = vadd.f32 %v3040_v3, %v1535_v26 }
 0x339   : > { %v3066_v39 = vmax.f32 %v3053_v24, 0.0 }
 0x33a   : > { %v3002_v33 = vpop.f32.mrf.mxu2 }
 0x33b   : > { %3079 = vst.msk [vmem:[%s4795_s25 + $0x38] sm:$0xff] %vm1973_vm0, %v3066_v39  ;;  %v3024_v25 = vadd.f32 %v3002_v33, %v4760_v11 }
 0x33d   : > { %v3041_v38 = vadd.f32 %v4785_v31, %v3024_v25 }
 0x33f   : > { %v3054_v21 = vadd.f32 %v3041_v38, %v1538_v48 }
 0x341   : > { %v3067_v13 = vmax.f32 %v3054_v21, 0.0 }
 0x342   : > { %v3004_v45 = vpop.f32.mrf.mxu2 }
 0x343   : > { %3080 = vst.msk [vmem:[%s4795_s25 + $0x40] sm:$0xff] %vm1973_vm0, %v3067_v13  ;;  %v3025_v10 = vadd.f32 %v3004_v45, %v4766_v59 }
 0x345   : > { %v3042_v58 = vadd.f32 %v4785_v31, %v3025_v10 }
 0x347   : > { %v3055_v4 = vadd.f32 %v3042_v58, %v1540_v32 }
 0x349   : > { %v3068_v11 = vmax.f32 %v3055_v4, 0.0 }
 0x34a   : > { %v3007_v54 = vpop.f32.mrf.mxu2 }
 0x34b   : > { %3081 = vst.msk [vmem:[%s4795_s25 + $0x48] sm:$0xff] %vm1973_vm0, %v3068_v11  ;;  %v3026_v28 = vadd.f32 %v3007_v54, %v4769_v30 }
 0x34d   : > { %v3043_v52 = vadd.f32 %v4785_v31, %v3026_v28 }
 0x34f   : > { %v3056_v18 = vadd.f32 %v3043_v52, %v1543_v35 }
 0x351   : > { %v3069_v59 = vmax.f32 %v3056_v18, 0.0 }
 0x352   : > { %v3009_v47 = vpop.f32.mrf.mxu2 }
 0x353   : > { %3082 = vst.msk [vmem:[%s4795_s25 + $0x50] sm:$0xff] %vm1973_vm0, %v3069_v59  ;;  %v3027_v37 = vadd.f32 %v3009_v47, %v4772_v16 }
 0x355   : > { %v3044_v12 = vadd.f32 %v4785_v31, %v3027_v37 }
 0x357   : > { %v3057_v49 = vadd.f32 %v3044_v12, %v1545_v6 }
 0x359   : > { %v3070_v30 = vmax.f32 %v3057_v49, 0.0 }
 0x35a   : > { %v3012_v41 = vpop.f32.mrf.mxu2 }
 0x35b   : > { %3083 = vst.msk [vmem:[%s4795_s25 + $0x58] sm:$0xff] %vm1973_vm0, %v3070_v30  ;;  %v3028_v40 = vadd.f32 %v3012_v41, %v4775_v15 }
 0x35d   : > { %v3045_v29 = vadd.f32 %v4785_v31, %v3028_v40 }
 0x35f   : > { %v3058_v53 = vadd.f32 %v3045_v29, %v1548_v1 }
 0x361   : > { %v3071_v46 = vmax.f32 %v3058_v53, 0.0 }
 0x362   : > { %v3014_v16 = vpop.f32.mrf.mxu2 }
 0x363   : > { %3084 = vst.msk [vmem:[%s4795_s25 + $0x60] sm:$0xf] %vm1672_vm4, %v3071_v46 }
 0x364 PF: > { %s18_s27 = sadd.s32 1, %s3674_s27  }
 0x365   : > { %p15_p4 = scmp.ge.s32.totalorder %s18_s27, 4  }
 0x367   :  { %17 = sbr.rel (!%p15_p4) target bundleno = 1 (0x1), region = 101 }

</bundles_post_ra>
